<compile_context>
chip_gen: v6e
topology: v6e:2x2x1
jax: 0.10.0
libtpu: 0.0.40
codegen_flags: <defaults>
</compile_context>

<pallas_src>
import functools

import jax
import jax.numpy as jnp
from jax.experimental import pallas as pl
from jax.experimental.pallas import tpu as pltpu


# Row layout of the packed per-layer "vecs" buffer (rows zero-padded to 128 lanes).
R_NORM, R_BIN, R_CW0, R_CW1, R_CW2, R_CB, R_BX, R_BDT, R_D, R_BOUT = range(10)
N_VEC_ROWS = 10
VEC_ROWS_PAD = 16          # pad sublane dim to a multiple of 8
LANE = 128


def _rup(v):
    return max(LANE, ((v + LANE - 1) // LANE) * LANE)


def _layer_kernel(x_ref, vecs_ref, w_in_ref, w_x_ref, w_dt_ref, a_logT_ref,
                  w_out_ref, normf_ref,
                  o_ref,
                  xact_ref, dA_ref, dBu_ref, y_ref,
                  *, n_layer, bt, seq_len, d_model, dt_rank, n_state, eps):
    """One Mamba layer for a batch tile of `bt` sequences (grid axis 1 = layer)."""
    il = pl.program_id(1)
    btl = bt * seq_len
    d_inner = w_in_ref.shape[1]
    inv_dm = 1.0 / d_model                       # real d_model, not the padded 128

    # ---- layer 0 prologue: stage (Bt, L, Dm) input into the flat (Bt*L, Dm) carry ----
    @pl.when(il == 0)
    def _():
        for b in range(bt):                      # static, tile-aligned (L % 8 == 0)
            xact_ref[pl.ds(b * seq_len, seq_len), :] = x_ref[b]

    x = xact_ref[...]                            # (Bt*L, Dm) f32, padded lanes == 0

    # ---- RMSNorm (norm1); padded lanes are zero so the lane sum is exact ----
    ms = jnp.sum(x * x, axis=-1, keepdims=True) * inv_dm
    xn = x * jax.lax.rsqrt(ms + eps) * vecs_ref[R_NORM:R_NORM + 1, :]

    # ---- in_proj (bf16 MXU operands, f32 accumulate); M = Bt*L rows ----
    h = (jnp.dot(xn.astype(jnp.bfloat16), w_in_ref[...],
                 preferred_element_type=jnp.float32)
         + vecs_ref[R_BIN:R_BIN + 1, :])          # (Bt*L, Di)

    # ---- depthwise Conv1d k=3, padding=1 (non-causal): XLU rolls + boundary masks ----
    t_in_seq = jax.lax.broadcasted_iota(jnp.int32, (btl, 1), 0) % seq_len
    h_prev = jnp.where(t_in_seq == 0, 0.0, pltpu.roll(h, 1, axis=0))           # x[t-1]
    h_next = jnp.where(t_in_seq == seq_len - 1, 0.0,
                       pltpu.roll(h, btl - 1, axis=0))                          # x[t+1]
    hc = (h_prev * vecs_ref[R_CW0:R_CW0 + 1, :]
          + h * vecs_ref[R_CW1:R_CW1 + 1, :]
          + h_next * vecs_ref[R_CW2:R_CW2 + 1, :]
          + vecs_ref[R_CB:R_CB + 1, :])

    # ---- SiLU (dropout = identity) ----
    u = hc * jax.nn.sigmoid(hc)

    # ---- fused x_proj; w_dt is zero-row-padded so xdb feeds it with no lane slice ----
    xdb = (jnp.dot(u.astype(jnp.bfloat16), w_x_ref[...],
                   preferred_element_type=jnp.float32)
           + vecs_ref[R_BX:R_BX + 1, :])          # lanes [0:dt_rank]=dt part, [dt_rank:dt_rank+n]=B
    delta = jax.nn.softplus(
        jnp.dot(xdb.astype(jnp.bfloat16), w_dt_ref[...],
                preferred_element_type=jnp.float32)
        + vecs_ref[R_BDT:R_BDT + 1, :])           # (Bt*L, Di)
    b_mat = xdb[:, dt_rank:dt_rank + n_state]     # (Bt*L, n)

    # ---- hoist exp + outer products out of the recurrence ----
    # TODO(synk): at production L chunk dA/dBu over the sequence (and/or store bf16
    # on v6e/v7x) to cap scratch VMEM and overlap the exp burst with the scan.
    a_t = -jnp.exp(a_logT_ref[...])               # (n, Di)
    du = delta * u
    dA_ref[...] = jnp.exp(delta[:, None, :] * a_t[None, :, :])   # (Bt*L, n, Di)
    dBu_ref[...] = b_mat[:, :, None] * du[:, None, :]            # (Bt*L, n, Di)

    # ---- blocked selective scan: 8 timesteps per fori iteration, one aligned
    #      (8, Di) block store per iteration (no per-step masked 1-row stores). ----
    # TODO(synk): associativize the scan (chunked first-order linear recurrence) to
    # shorten the serial chain further for long L.
    n_blk = seq_len // 8
    for b in range(bt):                           # static; independent state per sequence
        def blk(tb, state, _b=b):
            base = pl.multiple_of(_b * seq_len + tb * 8, 8)
            rows = []
            for j in range(8):                    # static unroll == sublane tile
                state = dA_ref[base + j] * state + dBu_ref[base + j]
                rows.append(jnp.sum(state, axis=0, keepdims=True))
            y_ref[pl.ds(base, 8), :] = jnp.concatenate(rows, axis=0)
            return state
        jax.lax.fori_loop(0, n_blk, blk,
                          jnp.zeros((n_state, d_inner), jnp.float32))

    y = y_ref[...] + u * vecs_ref[R_D:R_D + 1, :]                # + u * D

    # ---- out_proj; result becomes the next layer's input (stays in VMEM) ----
    xact_ref[...] = (jnp.dot(y.astype(jnp.bfloat16), w_out_ref[...],
                             preferred_element_type=jnp.float32)
                     + vecs_ref[R_BOUT:R_BOUT + 1, :])

    # ---- epilogue on the last layer: norm_f + per-sequence mean pool ----
    @pl.when(il == n_layer - 1)
    def _():
        xf = xact_ref[...]
        msf = jnp.sum(xf * xf, axis=-1, keepdims=True) * inv_dm
        xnf = xf * jax.lax.rsqrt(msf + eps) * normf_ref[...]
        pooled = jnp.concatenate(
            [jnp.mean(xnf[b * seq_len:(b + 1) * seq_len, :], axis=0, keepdims=True)
             for b in range(bt)], axis=0)          # (Bt, Dm)
        o_ref[...] = pooled.astype(o_ref.dtype)


def sequence_to_vector(input_ids, params, *, eps=1e-5, block_b=None):
    # Embedding lookup (gather) and the final output projection stay in plain JAX.
    emb = params['embedding']
    d_model = emb.shape[1]
    dt_rank = params['dt_rank']
    x = jnp.take(emb, input_ids, axis=0).astype(jnp.float32)      # (B, L, d_model)
    B, L, _ = x.shape
    assert L % 8 == 0, "seq_len must be a multiple of 8 (sublane tile)"

    n_layer, Dm, Di = params['w_in'].shape
    n_state = params['a_logT'].shape[1]
    if Dm > d_model:                                              # lane-dense padding
        x = jnp.pad(x, ((0, 0), (0, 0), (0, Dm - d_model)))

    # Batch tile: raise MXU M = Bt*L toward >= 256 rows; Bt must divide B.
    if block_b is None:
        need = -(-256 // L)
        block_b = next((d for d in range(1, B + 1) if B % d == 0 and d >= need), B)
    Bt = block_b
    assert B % Bt == 0
    num_bt = B // Bt

    kernel = functools.partial(
        _layer_kernel, n_layer=n_layer, bt=Bt, seq_len=L,
        d_model=d_model, dt_rank=dt_rank, n_state=n_state, eps=eps)

    def layer_spec(arr):                          # stream one layer's weights per step
        nz = arr.ndim - 1
        return pl.BlockSpec((None,) + arr.shape[1:],
                            lambda ib, il, _n=nz: (il,) + (0,) * _n)

    pooled = pl.pallas_call(
        kernel,
        grid=(num_bt, n_layer),
        in_specs=[
            pl.BlockSpec((Bt, L, Dm), lambda ib, il: (ib, 0, 0)),   # embeddings (per batch tile)
            layer_spec(params['vecs']),                             # per-layer vectors (packed)
            layer_spec(params['w_in']),
            layer_spec(params['w_x']),
            layer_spec(params['w_dt']),
            layer_spec(params['a_logT']),
            layer_spec(params['w_out']),
            pl.BlockSpec((1, Dm), lambda ib, il: (0, 0)),           # norm_f weight
        ],
        out_specs=pl.BlockSpec((None, Bt, Dm), lambda ib, il: (ib, 0, 0)),
        out_shape=jax.ShapeDtypeStruct((num_bt, Bt, Dm), jnp.float32),
        scratch_shapes=[
            pltpu.VMEM((Bt * L, Dm), jnp.float32),                  # activation carry
            pltpu.VMEM((Bt * L, n_state, Di), jnp.float32),         # dA
            pltpu.VMEM((Bt * L, n_state, Di), jnp.float32),         # dBu
            pltpu.VMEM((Bt * L, Di), jnp.float32),                  # y (fully rewritten each layer)
        ],
        compiler_params=pltpu.CompilerParams(
            dimension_semantics=("parallel", "arbitrary"),
            vmem_limit_bytes=48 * 1024 * 1024),                     # headroom under v7x 64 MiB/TC
    )(x, params['vecs'], params['w_in'], params['w_x'], params['w_dt'],
      params['a_logT'], params['w_out'], params['norm_f_w'])

    pooled = pooled.reshape(B, Dm)[:, :d_model]                     # drop padded lanes
    return jnp.dot(pooled, params['w_proj']) + params['b_proj']     # output_proj in XLA


def init_params(key, *, d_model, d_inner, n_ssm, dt_rank, vocab_size, n_layer,
                output_dim):
    n = n_ssm // 2
    dtn = dt_rank + n
    Dm, Di, DTN = _rup(d_model), _rup(d_inner), _rup(dtn)
    P = max(Dm, Di, DTN)

    k_emb, k_proj, k_layers = jax.random.split(key, 3)
    kp1, kp2 = jax.random.split(k_proj)

    def pad_row(v, width=P):
        return jnp.pad(v, (0, width - v.shape[0]))

    def pad_mat(a, rows, cols):
        return jnp.pad(a, ((0, rows - a.shape[0]), (0, cols - a.shape[1])))

    params = {
        'embedding': jax.random.normal(k_emb, (vocab_size, d_model), jnp.float32) * 0.02,
        'norm_f_w': pad_row(jnp.ones((d_model,), jnp.float32), Dm)[None, :],
        'w_proj': jax.random.normal(kp1, (d_model, output_dim), jnp.float32) * 0.05,
        'b_proj': jax.random.normal(kp2, (1, output_dim), jnp.float32) * 0.01,
        'dt_rank': dt_rank,                       # static config (not a traced leaf)
    }

    vecs, w_in, w_x, w_dt, a_logT, w_out = ([] for _ in range(6))
    for lk in jax.random.split(k_layers, n_layer):
        ks = jax.random.split(lk, 12)
        conv_w = jax.random.normal(ks[2], (3, d_inner), jnp.float32) * 0.2
        rows = [jnp.zeros((P,), jnp.float32)] * VEC_ROWS_PAD
        rows[R_NORM] = pad_row(jnp.ones((d_model,), jnp.float32))
        rows[R_BIN] = pad_row(jax.random.normal(ks[1], (d_inner,), jnp.float32) * 0.01)
        rows[R_CW0] = pad_row(conv_w[0])
        rows[R_CW1] = pad_row(conv_w[1])
        rows[R_CW2] = pad_row(conv_w[2])
        rows[R_CB] = pad_row(jax.random.normal(ks[3], (d_inner,), jnp.float32) * 0.01)
        rows[R_BX] = pad_row(jax.random.normal(ks[5], (dtn,), jnp.float32) * 0.01)
        rows[R_BDT] = pad_row(jax.random.normal(ks[7], (d_inner,), jnp.float32) * 0.01)
        rows[R_D] = pad_row(jax.random.normal(ks[9], (d_inner,), jnp.float32))
        rows[R_BOUT] = pad_row(jax.random.normal(ks[11], (d_model,), jnp.float32) * 0.01)
        vecs.append(jnp.stack(rows, axis=0))

        w_in.append(pad_mat(jax.random.normal(ks[0], (d_model, d_inner), jnp.float32) * 0.05, Dm, Di))
        # x_proj kept as ONE fused (d_inner, dt_rank+n) matrix (zero-padded lanes).
        w_x.append(pad_mat(jax.random.normal(ks[4], (d_inner, dtn), jnp.float32) * 0.05, Di, DTN))
        # dt_proj zero-row-padded to (DTN, Di): the fused xdb feeds it directly.
        w_dt.append(pad_mat(jax.random.normal(ks[6], (dt_rank, d_inner), jnp.float32) * 0.05, DTN, Di))
        # A_log stored pre-transposed (n, d_inner): no in-kernel transpose.
        a_logT.append(pad_mat((jax.random.normal(ks[8], (d_inner, n), jnp.float32) * 0.5).T, n, Di))
        w_out.append(pad_mat(jax.random.normal(ks[10], (d_inner, d_model), jnp.float32) * 0.05, Di, Dm))

    params['vecs'] = jnp.stack(vecs, axis=0)                        # (n_layer, 16, P) f32
    params['w_in'] = jnp.stack(w_in, axis=0).astype(jnp.bfloat16)
    params['w_x'] = jnp.stack(w_x, axis=0).astype(jnp.bfloat16)
    params['w_dt'] = jnp.stack(w_dt, axis=0).astype(jnp.bfloat16)
    params['a_logT'] = jnp.stack(a_logT, axis=0)                    # f32
    params['w_out'] = jnp.stack(w_out, axis=0).astype(jnp.bfloat16)
    return params


if __name__ == "__main__":
    d_model, d_inner, n_ssm, dt_rank = 32, 64, 16, 8
    vocab_size, n_layer, output_dim = 100, 2, 128
    batch, seq = 2, 16

    key = jax.random.PRNGKey(0)
    pkey, ikey = jax.random.split(key)
    params = init_params(pkey, d_model=d_model, d_inner=d_inner, n_ssm=n_ssm,
                         dt_rank=dt_rank, vocab_size=vocab_size,
                         n_layer=n_layer, output_dim=output_dim)
    input_ids = jax.random.randint(ikey, (batch, seq), 0, vocab_size, dtype=jnp.int32)

    out = jax.block_until_ready(sequence_to_vector(input_ids, params))
    assert out.shape == (batch, output_dim), out.shape
    assert bool(jnp.all(jnp.isfinite(out)))
    print("KERNEL_OK")
</pallas_src>

<mosaic_0001>
module attributes {stable_mosaic.version = 11 : i64} {
  func.func @_layer_kernel(%arg0: i32, %arg1: i32, %arg2: memref<2x16x128xf32, #tpu.memory_space<vmem>>, %arg3: memref<1x16x128xf32, #tpu.memory_space<vmem>>, %arg4: memref<1x128x128xbf16, #tpu.memory_space<vmem>>, %arg5: memref<1x128x128xbf16, #tpu.memory_space<vmem>>, %arg6: memref<1x128x128xbf16, #tpu.memory_space<vmem>>, %arg7: memref<1x8x128xf32, #tpu.memory_space<vmem>>, %arg8: memref<1x128x128xbf16, #tpu.memory_space<vmem>>, %arg9: memref<1x128xf32, #tpu.memory_space<vmem>>, %arg10: memref<1x2x128xf32, #tpu.memory_space<vmem>>, %arg11: memref<32x128xf32, #tpu.memory_space<vmem>>, %arg12: memref<32x8x128xf32, #tpu.memory_space<vmem>>, %arg13: memref<32x8x128xf32, #tpu.memory_space<vmem>>, %arg14: memref<32x128xf32, #tpu.memory_space<vmem>>) attributes {dimension_semantics = [#tpu.dimension_semantics<parallel>, #tpu.dimension_semantics<arbitrary>], iteration_bounds = array<i64: 1, 2>, scalar_prefetch = 0 : i64, scratch_operands = 4 : i64, tpu.core_type = #tpu.core_type<tc>, window_params = [{transform_indices = @transform_0, window_bounds = array<i64: 2, 16, 128>}, {transform_indices = @transform_1, window_bounds = array<i64: 1, 16, 128>}, {transform_indices = @transform_2, window_bounds = array<i64: 1, 128, 128>}, {transform_indices = @transform_3, window_bounds = array<i64: 1, 128, 128>}, {transform_indices = @transform_4, window_bounds = array<i64: 1, 128, 128>}, {transform_indices = @transform_5, window_bounds = array<i64: 1, 8, 128>}, {transform_indices = @transform_6, window_bounds = array<i64: 1, 128, 128>}, {pipeline_mode = #tpu.pipeline_mode<synchronous>, transform_indices = @transform_7, window_bounds = array<i64: 1, 128>}, {transform_indices = @transform_8, window_bounds = array<i64: 1, 2, 128>}]} {
    %c0_i32 = arith.constant 0 : i32
    %0 = arith.cmpi eq, %arg1, %c0_i32 : i32
    %1 = arith.extui %0 : i1 to i32
    %c0_i32_0 = arith.constant 0 : i32
    %2 = arith.cmpi ne, %1, %c0_i32_0 : i32
    scf.if %2 {
      %c0_77 = arith.constant 0 : index
      %c0_78 = arith.constant 0 : index
      %c0_79 = arith.constant 0 : index
      %155 = vector.load %arg2[%c0_77, %c0_78, %c0_79] : memref<2x16x128xf32, #tpu.memory_space<vmem>>, vector<1x16x128xf32>
      %156 = vector.shape_cast %155 : vector<1x16x128xf32> to vector<16x128xf32>
      %c0_80 = arith.constant 0 : index
      %c0_81 = arith.constant 0 : index
      %157 = vector.load %arg11[%c0_80, %c0_81] : memref<32x128xf32, #tpu.memory_space<vmem>>, vector<16x128xf32>
      tpu.vector_store %arg11[%c0_80, %c0_81], %156 {strides = array<i32>} : memref<32x128xf32, #tpu.memory_space<vmem>>, vector<16x128xf32>,
      %c1_82 = arith.constant 1 : index
      %c0_83 = arith.constant 0 : index
      %c0_84 = arith.constant 0 : index
      %158 = vector.load %arg2[%c1_82, %c0_83, %c0_84] : memref<2x16x128xf32, #tpu.memory_space<vmem>>, vector<1x16x128xf32>
      %159 = vector.shape_cast %158 : vector<1x16x128xf32> to vector<16x128xf32>
      %c16 = arith.constant 16 : index
      %c0_85 = arith.constant 0 : index
      %160 = vector.load %arg11[%c16, %c0_85] : memref<32x128xf32, #tpu.memory_space<vmem>>, vector<16x128xf32>
      tpu.vector_store %arg11[%c16, %c0_85], %159 {strides = array<i32>} : memref<32x128xf32, #tpu.memory_space<vmem>>, vector<16x128xf32>,
    } else {
    }
    %c0 = arith.constant 0 : index
    %c0_1 = arith.constant 0 : index
    %3 = vector.load %arg11[%c0, %c0_1] : memref<32x128xf32, #tpu.memory_space<vmem>>, vector<32x128xf32>
    %4 = arith.mulf %3, %3 : vector<32x128xf32>
    %cst = arith.constant dense<0.000000e+00> : vector<32xf32>
    %5 = vector.multi_reduction <add>, %4, %cst [1] : vector<32x128xf32> to vector<32xf32>
    %6 = vector.shape_cast %5 : vector<32xf32> to vector<32x1xf32>
    %cst_2 = arith.constant 3.125000e-02 : f32
    %7 = vector.broadcast %cst_2 : f32 to vector<32x1xf32>
    %8 = arith.mulf %6, %7 : vector<32x1xf32>
    %cst_3 = arith.constant 9.99999974E-6 : f32
    %9 = vector.broadcast %cst_3 : f32 to vector<32x1xf32>
    %10 = arith.addf %8, %9 : vector<32x1xf32>
    %11 = math.rsqrt %10 : vector<32x1xf32>
    %12 = vector.broadcast %11 : vector<32x1xf32> to vector<32x128xf32>
    %13 = arith.mulf %3, %12 : vector<32x128xf32>
    %c0_4 = arith.constant 0 : index
    %c0_5 = arith.constant 0 : index
    %c0_6 = arith.constant 0 : index
    %14 = vector.load %arg3[%c0_4, %c0_5, %c0_6] : memref<1x16x128xf32, #tpu.memory_space<vmem>>, vector<1x1x128xf32>
    %15 = vector.shape_cast %14 : vector<1x1x128xf32> to vector<1x128xf32>
    %16 = vector.broadcast %15 : vector<1x128xf32> to vector<32x128xf32>
    %17 = arith.mulf %13, %16 : vector<32x128xf32>
    %18 = arith.truncf %17 : vector<32x128xf32> to vector<32x128xbf16>
    %c0_7 = arith.constant 0 : index
    %c0_8 = arith.constant 0 : index
    %c0_9 = arith.constant 0 : index
    %19 = vector.load %arg4[%c0_7, %c0_8, %c0_9] : memref<1x128x128xbf16, #tpu.memory_space<vmem>>, vector<1x128x128xbf16>
    %20 = vector.shape_cast %19 : vector<1x128x128xbf16> to vector<128x128xbf16>
    %cst_10 = arith.constant dense<0.000000e+00> : vector<32x128xf32>
    %21 = tpu.matmul %18, %20, %cst_10 {dimension_numbers = #tpu.dot_dimension_numbers<[1], [0], [0], [1], [0, 0, 1, 1], [], []>} : vector<32x128xbf16>, vector<128x128xbf16>, vector<32x128xf32> -> vector<32x128xf32>
    %c0_11 = arith.constant 0 : index
    %c1 = arith.constant 1 : index
    %c0_12 = arith.constant 0 : index
    %22 = vector.load %arg3[%c0_11, %c1, %c0_12] : memref<1x16x128xf32, #tpu.memory_space<vmem>>, vector<1x1x128xf32>
    %23 = vector.shape_cast %22 : vector<1x1x128xf32> to vector<1x128xf32>
    %24 = vector.broadcast %23 : vector<1x128xf32> to vector<32x128xf32>
    %25 = arith.addf %21, %24 : vector<32x128xf32>
    %26 = tpu.iota {dimensions = array<i32: 0>} : vector<32x1xi32>
    %c16_i32 = arith.constant 16 : i32
    %c0_i32_13 = arith.constant 0 : i32
    %27 = arith.cmpi eq, %c16_i32, %c0_i32_13 : i32
    %c1_i32 = arith.constant 1 : i32
    %28 = arith.select %27, %c1_i32, %c16_i32 : i32
    %29 = vector.broadcast %28 : i32 to vector<32x1xi32>
    %30 = arith.remsi %26, %29 : vector<32x1xi32>
    %c0_i32_14 = arith.constant 0 : i32
    %31 = vector.broadcast %c0_i32_14 : i32 to vector<32x1xi32>
    %32 = arith.cmpi ne, %30, %31 : vector<32x1xi32>
    %c0_i32_15 = arith.constant 0 : i32
    %33 = vector.broadcast %c0_i32_15 : i32 to vector<32x1xi32>
    %34 = arith.cmpi slt, %30, %33 : vector<32x1xi32>
    %c0_i32_16 = arith.constant 0 : i32
    %35 = arith.cmpi slt, %28, %c0_i32_16 : i32
    %36 = vector.broadcast %35 : i1 to vector<32x1xi1>
    %37 = vector.broadcast %36 : vector<32x1xi1> to vector<32x1xi1>
    %38 = arith.xori %34, %37 : vector<32x1xi1>
    %39 = arith.andi %38, %32 : vector<32x1xi1>
    %40 = vector.broadcast %28 : i32 to vector<32x1xi32>
    %41 = arith.addi %30, %40 : vector<32x1xi32>
    %42 = arith.select %39, %41, %30 : vector<32x1xi1>, vector<32x1xi32>
    %c0_i32_17 = arith.constant 0 : i32
    %43 = vector.broadcast %c0_i32_17 : i32 to vector<32x1xi32>
    %44 = arith.cmpi eq, %42, %43 : vector<32x1xi32>
    %c1_i32_18 = arith.constant 1 : i32
    %45 = tpu.dynamic_rotate %25 by %c1_i32_18 dim 0 : vector<32x128xf32>, i32 -> vector<32x128xf32>
    %cst_19 = arith.constant 0.000000e+00 : f32
    %46 = vector.shape_cast %44 : vector<32x1xi1> to vector<32x1xi1>
    %47 = vector.broadcast %46 : vector<32x1xi1> to vector<32x128xi1>
    %48 = vector.broadcast %cst_19 : f32 to vector<32x128xf32>
    %49 = arith.select %47, %48, %45 : vector<32x128xi1>, vector<32x128xf32>
    %c15_i32 = arith.constant 15 : i32
    %50 = vector.broadcast %c15_i32 : i32 to vector<32x1xi32>
    %51 = arith.cmpi eq, %42, %50 : vector<32x1xi32>
    %c31_i32 = arith.constant 31 : i32
    %52 = tpu.dynamic_rotate %25 by %c31_i32 dim 0 : vector<32x128xf32>, i32 -> vector<32x128xf32>
    %cst_20 = arith.constant 0.000000e+00 : f32
    %53 = vector.shape_cast %51 : vector<32x1xi1> to vector<32x1xi1>
    %54 = vector.broadcast %53 : vector<32x1xi1> to vector<32x128xi1>
    %55 = vector.broadcast %cst_20 : f32 to vector<32x128xf32>
    %56 = arith.select %54, %55, %52 : vector<32x128xi1>, vector<32x128xf32>
    %c0_21 = arith.constant 0 : index
    %c2 = arith.constant 2 : index
    %c0_22 = arith.constant 0 : index
    %57 = vector.load %arg3[%c0_21, %c2, %c0_22] : memref<1x16x128xf32, #tpu.memory_space<vmem>>, vector<1x1x128xf32>
    %58 = vector.shape_cast %57 : vector<1x1x128xf32> to vector<1x128xf32>
    %59 = vector.broadcast %58 : vector<1x128xf32> to vector<32x128xf32>
    %60 = arith.mulf %49, %59 : vector<32x128xf32>
    %c0_23 = arith.constant 0 : index
    %c3 = arith.constant 3 : index
    %c0_24 = arith.constant 0 : index
    %61 = vector.load %arg3[%c0_23, %c3, %c0_24] : memref<1x16x128xf32, #tpu.memory_space<vmem>>, vector<1x1x128xf32>
    %62 = vector.shape_cast %61 : vector<1x1x128xf32> to vector<1x128xf32>
    %63 = vector.broadcast %62 : vector<1x128xf32> to vector<32x128xf32>
    %64 = arith.mulf %25, %63 : vector<32x128xf32>
    %65 = arith.addf %60, %64 : vector<32x128xf32>
    %c0_25 = arith.constant 0 : index
    %c4 = arith.constant 4 : index
    %c0_26 = arith.constant 0 : index
    %66 = vector.load %arg3[%c0_25, %c4, %c0_26] : memref<1x16x128xf32, #tpu.memory_space<vmem>>, vector<1x1x128xf32>
    %67 = vector.shape_cast %66 : vector<1x1x128xf32> to vector<1x128xf32>
    %68 = vector.broadcast %67 : vector<1x128xf32> to vector<32x128xf32>
    %69 = arith.mulf %56, %68 : vector<32x128xf32>
    %70 = arith.addf %65, %69 : vector<32x128xf32>
    %c0_27 = arith.constant 0 : index
    %c5 = arith.constant 5 : index
    %c0_28 = arith.constant 0 : index
    %71 = vector.load %arg3[%c0_27, %c5, %c0_28] : memref<1x16x128xf32, #tpu.memory_space<vmem>>, vector<1x1x128xf32>
    %72 = vector.shape_cast %71 : vector<1x1x128xf32> to vector<1x128xf32>
    %73 = vector.broadcast %72 : vector<1x128xf32> to vector<32x128xf32>
    %74 = arith.addf %70, %73 : vector<32x128xf32>
    %75 = arith.negf %74 : vector<32x128xf32>
    %76 = math.exp %75 : vector<32x128xf32>
    %cst_29 = arith.constant 1.000000e+00 : f32
    %77 = vector.broadcast %cst_29 : f32 to vector<32x128xf32>
    %78 = arith.addf %77, %76 : vector<32x128xf32>
    %79 = arith.divf %77, %78 : vector<32x128xf32>
    %80 = arith.mulf %74, %79 : vector<32x128xf32>
    %81 = arith.truncf %80 : vector<32x128xf32> to vector<32x128xbf16>
    %c0_30 = arith.constant 0 : index
    %c0_31 = arith.constant 0 : index
    %c0_32 = arith.constant 0 : index
    %82 = vector.load %arg5[%c0_30, %c0_31, %c0_32] : memref<1x128x128xbf16, #tpu.memory_space<vmem>>, vector<1x128x128xbf16>
    %83 = vector.shape_cast %82 : vector<1x128x128xbf16> to vector<128x128xbf16>
    %cst_33 = arith.constant dense<0.000000e+00> : vector<32x128xf32>
    %84 = tpu.matmul %81, %83, %cst_33 {dimension_numbers = #tpu.dot_dimension_numbers<[1], [0], [0], [1], [0, 0, 1, 1], [], []>} : vector<32x128xbf16>, vector<128x128xbf16>, vector<32x128xf32> -> vector<32x128xf32>
    %c0_34 = arith.constant 0 : index
    %c6 = arith.constant 6 : index
    %c0_35 = arith.constant 0 : index
    %85 = vector.load %arg3[%c0_34, %c6, %c0_35] : memref<1x16x128xf32, #tpu.memory_space<vmem>>, vector<1x1x128xf32>
    %86 = vector.shape_cast %85 : vector<1x1x128xf32> to vector<1x128xf32>
    %87 = vector.broadcast %86 : vector<1x128xf32> to vector<32x128xf32>
    %88 = arith.addf %84, %87 : vector<32x128xf32>
    %89 = arith.truncf %88 : vector<32x128xf32> to vector<32x128xbf16>
    %c0_36 = arith.constant 0 : index
    %c0_37 = arith.constant 0 : index
    %c0_38 = arith.constant 0 : index
    %90 = vector.load %arg6[%c0_36, %c0_37, %c0_38] : memref<1x128x128xbf16, #tpu.memory_space<vmem>>, vector<1x128x128xbf16>
    %91 = vector.shape_cast %90 : vector<1x128x128xbf16> to vector<128x128xbf16>
    %cst_39 = arith.constant dense<0.000000e+00> : vector<32x128xf32>
    %92 = tpu.matmul %89, %91, %cst_39 {dimension_numbers = #tpu.dot_dimension_numbers<[1], [0], [0], [1], [0, 0, 1, 1], [], []>} : vector<32x128xbf16>, vector<128x128xbf16>, vector<32x128xf32> -> vector<32x128xf32>
    %c0_40 = arith.constant 0 : index
    %c7 = arith.constant 7 : index
    %c0_41 = arith.constant 0 : index
    %93 = vector.load %arg3[%c0_40, %c7, %c0_41] : memref<1x16x128xf32, #tpu.memory_space<vmem>>, vector<1x1x128xf32>
    %94 = vector.shape_cast %93 : vector<1x1x128xf32> to vector<1x128xf32>
    %95 = vector.broadcast %94 : vector<1x128xf32> to vector<32x128xf32>
    %96 = arith.addf %92, %95 : vector<32x128xf32>
    %cst_42 = arith.constant 0.000000e+00 : f32
    %97 = vector.broadcast %cst_42 : f32 to vector<32x128xf32>
    %98 = arith.maximumf %96, %97 : vector<32x128xf32>
    %99 = vector.broadcast %cst_42 : f32 to vector<32x128xf32>
    %100 = arith.subf %96, %99 : vector<32x128xf32>
    %101 = arith.cmpf one, %100, %100 : vector<32x128xf32>
    %102 = vector.broadcast %cst_42 : f32 to vector<32x128xf32>
    %103 = arith.addf %96, %102 : vector<32x128xf32>
    %104 = math.absf %100 : vector<32x128xf32>
    %cst_43 = arith.constant 0.000000e+00 : f32
    %105 = vector.broadcast %cst_43 : f32 to vector<32x128xf32>
    %106 = arith.subf %105, %104 : vector<32x128xf32>
    %107 = math.exp %106 : vector<32x128xf32>
    %108 = math.log1p %107 : vector<32x128xf32>
    %109 = arith.addf %98, %108 : vector<32x128xf32>
    %110 = arith.select %101, %103, %109 : vector<32x128xi1>, vector<32x128xf32>
    %111 = vector.extract_strided_slice %88 {offsets = [0, 8], sizes = [32, 8], strides = [1, 1]} : vector<32x128xf32> to vector<32x8xf32>
    %c0_44 = arith.constant 0 : index
    %c0_45 = arith.constant 0 : index
    %c0_46 = arith.constant 0 : index
    %112 = vector.load %arg7[%c0_44, %c0_45, %c0_46] : memref<1x8x128xf32, #tpu.memory_space<vmem>>, vector<1x8x128xf32>
    %113 = vector.shape_cast %112 : vector<1x8x128xf32> to vector<8x128xf32>
    %114 = math.exp %113 : vector<8x128xf32>
    %cst_47 = arith.constant 0.000000e+00 : f32
    %115 = vector.broadcast %cst_47 : f32 to vector<8x128xf32>
    %116 = arith.subf %115, %114 : vector<8x128xf32>
    %117 = arith.mulf %110, %80 : vector<32x128xf32>
    %118 = vector.shape_cast %110 : vector<32x128xf32> to vector<32x1x128xf32>
    %119 = vector.shape_cast %116 : vector<8x128xf32> to vector<1x8x128xf32>
    %120 = vector.broadcast %118 : vector<32x1x128xf32> to vector<32x8x128xf32>
    %121 = vector.broadcast %119 : vector<1x8x128xf32> to vector<32x8x128xf32>
    %122 = arith.mulf %120, %121 : vector<32x8x128xf32>
    %123 = math.exp %122 : vector<32x8x128xf32>
    %c0_48 = arith.constant 0 : index
    %c0_49 = arith.constant 0 : index
    %c0_50 = arith.constant 0 : index
    %124 = vector.load %arg12[%c0_48, %c0_49, %c0_50] : memref<32x8x128xf32, #tpu.memory_space<vmem>>, vector<32x8x128xf32>
    tpu.vector_store %arg12[%c0_48, %c0_49, %c0_50], %123 {strides = array<i32>} : memref<32x8x128xf32, #tpu.memory_space<vmem>>, vector<32x8x128xf32>,
    %125 = vector.shape_cast %111 : vector<32x8xf32> to vector<32x8x1xf32>
    %126 = vector.shape_cast %117 : vector<32x128xf32> to vector<32x1x128xf32>
    %127 = vector.broadcast %125 : vector<32x8x1xf32> to vector<32x8x128xf32>
    %128 = vector.broadcast %126 : vector<32x1x128xf32> to vector<32x8x128xf32>
    %129 = arith.mulf %127, %128 : vector<32x8x128xf32>
    %c0_51 = arith.constant 0 : index
    %c0_52 = arith.constant 0 : index
    %c0_53 = arith.constant 0 : index
    %130 = vector.load %arg13[%c0_51, %c0_52, %c0_53] : memref<32x8x128xf32, #tpu.memory_space<vmem>>, vector<32x8x128xf32>
    tpu.vector_store %arg13[%c0_51, %c0_52, %c0_53], %129 {strides = array<i32>} : memref<32x8x128xf32, #tpu.memory_space<vmem>>, vector<32x8x128xf32>,
    %cst_54 = arith.constant 0.000000e+00 : f32
    %131 = vector.broadcast %cst_54 : f32 to vector<8x128xf32>
    %c0_i32_55 = arith.constant 0 : i32
    %c2_i32 = arith.constant 2 : i32
    %132 = arith.addi %c0_i32_55, %c2_i32 : i32
    %c1_i32_56 = arith.constant 1 : i32
    %133 = scf.for %arg15 = %c0_i32_55 to %132 step %c1_i32_56 iter_args(%arg16 = %131) -> (vector<8x128xf32>)  : i32 {
      %c8_i32 = arith.constant 8 : i32
      %155 = arith.muli %arg15, %c8_i32 : i32
      %c0_i32_77 = arith.constant 0 : i32
      %156 = arith.addi %c0_i32_77, %155 : i32
      %157 = tpu.assume_multiple %156, 8 : i32
      %c0_i32_78 = arith.constant 0 : i32
      %158 = arith.addi %157, %c0_i32_78 : i32
      %159 = arith.index_cast %158 : i32 to index
      %c0_79 = arith.constant 0 : index
      %c0_80 = arith.constant 0 : index
      %160 = vector.load %arg12[%159, %c0_79, %c0_80] : memref<32x8x128xf32, #tpu.memory_space<vmem>>, vector<1x8x128xf32>
      %161 = vector.shape_cast %160 : vector<1x8x128xf32> to vector<8x128xf32>
      %162 = arith.mulf %161, %arg16 : vector<8x128xf32>
      %c0_i32_81 = arith.constant 0 : i32
      %163 = arith.addi %157, %c0_i32_81 : i32
      %164 = arith.index_cast %163 : i32 to index
      %c0_82 = arith.constant 0 : index
      %c0_83 = arith.constant 0 : index
      %165 = vector.load %arg13[%164, %c0_82, %c0_83] : memref<32x8x128xf32, #tpu.memory_space<vmem>>, vector<1x8x128xf32>
      %166 = vector.shape_cast %165 : vector<1x8x128xf32> to vector<8x128xf32>
      %167 = arith.addf %162, %166 : vector<8x128xf32>
      %cst_84 = arith.constant dense<0.000000e+00> : vector<128xf32>
      %168 = vector.multi_reduction <add>, %167, %cst_84 [0] : vector<8x128xf32> to vector<128xf32>
      %169 = vector.shape_cast %168 : vector<128xf32> to vector<1x128xf32>
      %c1_i32_85 = arith.constant 1 : i32
      %170 = arith.addi %157, %c1_i32_85 : i32
      %171 = arith.index_cast %170 : i32 to index
      %c0_86 = arith.constant 0 : index
      %c0_87 = arith.constant 0 : index
      %172 = vector.load %arg12[%171, %c0_86, %c0_87] : memref<32x8x128xf32, #tpu.memory_space<vmem>>, vector<1x8x128xf32>
      %173 = vector.shape_cast %172 : vector<1x8x128xf32> to vector<8x128xf32>
      %174 = arith.mulf %173, %167 : vector<8x128xf32>
      %c1_i32_88 = arith.constant 1 : i32
      %175 = arith.addi %157, %c1_i32_88 : i32
      %176 = arith.index_cast %175 : i32 to index
      %c0_89 = arith.constant 0 : index
      %c0_90 = arith.constant 0 : index
      %177 = vector.load %arg13[%176, %c0_89, %c0_90] : memref<32x8x128xf32, #tpu.memory_space<vmem>>, vector<1x8x128xf32>
      %178 = vector.shape_cast %177 : vector<1x8x128xf32> to vector<8x128xf32>
      %179 = arith.addf %174, %178 : vector<8x128xf32>
      %cst_91 = arith.constant dense<0.000000e+00> : vector<128xf32>
      %180 = vector.multi_reduction <add>, %179, %cst_91 [0] : vector<8x128xf32> to vector<128xf32>
      %181 = vector.shape_cast %180 : vector<128xf32> to vector<1x128xf32>
      %c2_i32_92 = arith.constant 2 : i32
      %182 = arith.addi %157, %c2_i32_92 : i32
      %183 = arith.index_cast %182 : i32 to index
      %c0_93 = arith.constant 0 : index
      %c0_94 = arith.constant 0 : index
      %184 = vector.load %arg12[%183, %c0_93, %c0_94] : memref<32x8x128xf32, #tpu.memory_space<vmem>>, vector<1x8x128xf32>
      %185 = vector.shape_cast %184 : vector<1x8x128xf32> to vector<8x128xf32>
      %186 = arith.mulf %185, %179 : vector<8x128xf32>
      %c2_i32_95 = arith.constant 2 : i32
      %187 = arith.addi %157, %c2_i32_95 : i32
      %188 = arith.index_cast %187 : i32 to index
      %c0_96 = arith.constant 0 : index
      %c0_97 = arith.constant 0 : index
      %189 = vector.load %arg13[%188, %c0_96, %c0_97] : memref<32x8x128xf32, #tpu.memory_space<vmem>>, vector<1x8x128xf32>
      %190 = vector.shape_cast %189 : vector<1x8x128xf32> to vector<8x128xf32>
      %191 = arith.addf %186, %190 : vector<8x128xf32>
      %cst_98 = arith.constant dense<0.000000e+00> : vector<128xf32>
      %192 = vector.multi_reduction <add>, %191, %cst_98 [0] : vector<8x128xf32> to vector<128xf32>
      %193 = vector.shape_cast %192 : vector<128xf32> to vector<1x128xf32>
      %c3_i32 = arith.constant 3 : i32
      %194 = arith.addi %157, %c3_i32 : i32
      %195 = arith.index_cast %194 : i32 to index
      %c0_99 = arith.constant 0 : index
      %c0_100 = arith.constant 0 : index
      %196 = vector.load %arg12[%195, %c0_99, %c0_100] : memref<32x8x128xf32, #tpu.memory_space<vmem>>, vector<1x8x128xf32>
      %197 = vector.shape_cast %196 : vector<1x8x128xf32> to vector<8x128xf32>
      %198 = arith.mulf %197, %191 : vector<8x128xf32>
      %c3_i32_101 = arith.constant 3 : i32
      %199 = arith.addi %157, %c3_i32_101 : i32
      %200 = arith.index_cast %199 : i32 to index
      %c0_102 = arith.constant 0 : index
      %c0_103 = arith.constant 0 : index
      %201 = vector.load %arg13[%200, %c0_102, %c0_103] : memref<32x8x128xf32, #tpu.memory_space<vmem>>, vector<1x8x128xf32>
      %202 = vector.shape_cast %201 : vector<1x8x128xf32> to vector<8x128xf32>
      %203 = arith.addf %198, %202 : vector<8x128xf32>
      %cst_104 = arith.constant dense<0.000000e+00> : vector<128xf32>
      %204 = vector.multi_reduction <add>, %203, %cst_104 [0] : vector<8x128xf32> to vector<128xf32>
      %205 = vector.shape_cast %204 : vector<128xf32> to vector<1x128xf32>
      %c4_i32 = arith.constant 4 : i32
      %206 = arith.addi %157, %c4_i32 : i32
      %207 = arith.index_cast %206 : i32 to index
      %c0_105 = arith.constant 0 : index
      %c0_106 = arith.constant 0 : index
      %208 = vector.load %arg12[%207, %c0_105, %c0_106] : memref<32x8x128xf32, #tpu.memory_space<vmem>>, vector<1x8x128xf32>
      %209 = vector.shape_cast %208 : vector<1x8x128xf32> to vector<8x128xf32>
      %210 = arith.mulf %209, %203 : vector<8x128xf32>
      %c4_i32_107 = arith.constant 4 : i32
      %211 = arith.addi %157, %c4_i32_107 : i32
      %212 = arith.index_cast %211 : i32 to index
      %c0_108 = arith.constant 0 : index
      %c0_109 = arith.constant 0 : index
      %213 = vector.load %arg13[%212, %c0_108, %c0_109] : memref<32x8x128xf32, #tpu.memory_space<vmem>>, vector<1x8x128xf32>
      %214 = vector.shape_cast %213 : vector<1x8x128xf32> to vector<8x128xf32>
      %215 = arith.addf %210, %214 : vector<8x128xf32>
      %cst_110 = arith.constant dense<0.000000e+00> : vector<128xf32>
      %216 = vector.multi_reduction <add>, %215, %cst_110 [0] : vector<8x128xf32> to vector<128xf32>
      %217 = vector.shape_cast %216 : vector<128xf32> to vector<1x128xf32>
      %c5_i32 = arith.constant 5 : i32
      %218 = arith.addi %157, %c5_i32 : i32
      %219 = arith.index_cast %218 : i32 to index
      %c0_111 = arith.constant 0 : index
      %c0_112 = arith.constant 0 : index
      %220 = vector.load %arg12[%219, %c0_111, %c0_112] : memref<32x8x128xf32, #tpu.memory_space<vmem>>, vector<1x8x128xf32>
      %221 = vector.shape_cast %220 : vector<1x8x128xf32> to vector<8x128xf32>
      %222 = arith.mulf %221, %215 : vector<8x128xf32>
      %c5_i32_113 = arith.constant 5 : i32
      %223 = arith.addi %157, %c5_i32_113 : i32
      %224 = arith.index_cast %223 : i32 to index
      %c0_114 = arith.constant 0 : index
      %c0_115 = arith.constant 0 : index
      %225 = vector.load %arg13[%224, %c0_114, %c0_115] : memref<32x8x128xf32, #tpu.memory_space<vmem>>, vector<1x8x128xf32>
      %226 = vector.shape_cast %225 : vector<1x8x128xf32> to vector<8x128xf32>
      %227 = arith.addf %222, %226 : vector<8x128xf32>
      %cst_116 = arith.constant dense<0.000000e+00> : vector<128xf32>
      %228 = vector.multi_reduction <add>, %227, %cst_116 [0] : vector<8x128xf32> to vector<128xf32>
      %229 = vector.shape_cast %228 : vector<128xf32> to vector<1x128xf32>
      %c6_i32 = arith.constant 6 : i32
      %230 = arith.addi %157, %c6_i32 : i32
      %231 = arith.index_cast %230 : i32 to index
      %c0_117 = arith.constant 0 : index
      %c0_118 = arith.constant 0 : index
      %232 = vector.load %arg12[%231, %c0_117, %c0_118] : memref<32x8x128xf32, #tpu.memory_space<vmem>>, vector<1x8x128xf32>
      %233 = vector.shape_cast %232 : vector<1x8x128xf32> to vector<8x128xf32>
      %234 = arith.mulf %233, %227 : vector<8x128xf32>
      %c6_i32_119 = arith.constant 6 : i32
      %235 = arith.addi %157, %c6_i32_119 : i32
      %236 = arith.index_cast %235 : i32 to index
      %c0_120 = arith.constant 0 : index
      %c0_121 = arith.constant 0 : index
      %237 = vector.load %arg13[%236, %c0_120, %c0_121] : memref<32x8x128xf32, #tpu.memory_space<vmem>>, vector<1x8x128xf32>
      %238 = vector.shape_cast %237 : vector<1x8x128xf32> to vector<8x128xf32>
      %239 = arith.addf %234, %238 : vector<8x128xf32>
      %cst_122 = arith.constant dense<0.000000e+00> : vector<128xf32>
      %240 = vector.multi_reduction <add>, %239, %cst_122 [0] : vector<8x128xf32> to vector<128xf32>
      %241 = vector.shape_cast %240 : vector<128xf32> to vector<1x128xf32>
      %c7_i32 = arith.constant 7 : i32
      %242 = arith.addi %157, %c7_i32 : i32
      %243 = arith.index_cast %242 : i32 to index
      %c0_123 = arith.constant 0 : index
      %c0_124 = arith.constant 0 : index
      %244 = vector.load %arg12[%243, %c0_123, %c0_124] : memref<32x8x128xf32, #tpu.memory_space<vmem>>, vector<1x8x128xf32>
      %245 = vector.shape_cast %244 : vector<1x8x128xf32> to vector<8x128xf32>
      %246 = arith.mulf %245, %239 : vector<8x128xf32>
      %c7_i32_125 = arith.constant 7 : i32
      %247 = arith.addi %157, %c7_i32_125 : i32
      %248 = arith.index_cast %247 : i32 to index
      %c0_126 = arith.constant 0 : index
      %c0_127 = arith.constant 0 : index
      %249 = vector.load %arg13[%248, %c0_126, %c0_127] : memref<32x8x128xf32, #tpu.memory_space<vmem>>, vector<1x8x128xf32>
      %250 = vector.shape_cast %249 : vector<1x8x128xf32> to vector<8x128xf32>
      %251 = arith.addf %246, %250 : vector<8x128xf32>
      %cst_128 = arith.constant dense<0.000000e+00> : vector<128xf32>
      %252 = vector.multi_reduction <add>, %251, %cst_128 [0] : vector<8x128xf32> to vector<128xf32>
      %253 = vector.shape_cast %252 : vector<128xf32> to vector<1x128xf32>
      %254 = tpu.concatenate %169, %181, %193, %205, %217, %229, %241, %253 in 0 : vector<1x128xf32>, vector<1x128xf32>, vector<1x128xf32>, vector<1x128xf32>, vector<1x128xf32>, vector<1x128xf32>, vector<1x128xf32>, vector<1x128xf32> -> vector<8x128xf32>
      %255 = arith.index_cast %157 : i32 to index
      %c0_129 = arith.constant 0 : index
      %256 = vector.load %arg14[%255, %c0_129] : memref<32x128xf32, #tpu.memory_space<vmem>>, vector<8x128xf32>
      tpu.vector_store %arg14[%255, %c0_129], %254 {strides = array<i32>} : memref<32x128xf32, #tpu.memory_space<vmem>>, vector<8x128xf32>,
      scf.yield %251 : vector<8x128xf32>
    }
    %c2_i32_57 = arith.constant 2 : i32
    %cst_58 = arith.constant 0.000000e+00 : f32
    %134 = vector.broadcast %cst_58 : f32 to vector<8x128xf32>
    %c0_i32_59 = arith.constant 0 : i32
    %c2_i32_60 = arith.constant 2 : i32
    %135 = arith.addi %c0_i32_59, %c2_i32_60 : i32
    %c1_i32_61 = arith.constant 1 : i32
    %136 = scf.for %arg15 = %c0_i32_59 to %135 step %c1_i32_61 iter_args(%arg16 = %134) -> (vector<8x128xf32>)  : i32 {
      %c8_i32 = arith.constant 8 : i32
      %155 = arith.muli %arg15, %c8_i32 : i32
      %c16_i32_77 = arith.constant 16 : i32
      %156 = arith.addi %c16_i32_77, %155 : i32
      %157 = tpu.assume_multiple %156, 8 : i32
      %c0_i32_78 = arith.constant 0 : i32
      %158 = arith.addi %157, %c0_i32_78 : i32
      %159 = arith.index_cast %158 : i32 to index
      %c0_79 = arith.constant 0 : index
      %c0_80 = arith.constant 0 : index
      %160 = vector.load %arg12[%159, %c0_79, %c0_80] : memref<32x8x128xf32, #tpu.memory_space<vmem>>, vector<1x8x128xf32>
      %161 = vector.shape_cast %160 : vector<1x8x128xf32> to vector<8x128xf32>
      %162 = arith.mulf %161, %arg16 : vector<8x128xf32>
      %c0_i32_81 = arith.constant 0 : i32
      %163 = arith.addi %157, %c0_i32_81 : i32
      %164 = arith.index_cast %163 : i32 to index
      %c0_82 = arith.constant 0 : index
      %c0_83 = arith.constant 0 : index
      %165 = vector.load %arg13[%164, %c0_82, %c0_83] : memref<32x8x128xf32, #tpu.memory_space<vmem>>, vector<1x8x128xf32>
      %166 = vector.shape_cast %165 : vector<1x8x128xf32> to vector<8x128xf32>
      %167 = arith.addf %162, %166 : vector<8x128xf32>
      %cst_84 = arith.constant dense<0.000000e+00> : vector<128xf32>
      %168 = vector.multi_reduction <add>, %167, %cst_84 [0] : vector<8x128xf32> to vector<128xf32>
      %169 = vector.shape_cast %168 : vector<128xf32> to vector<1x128xf32>
      %c1_i32_85 = arith.constant 1 : i32
      %170 = arith.addi %157, %c1_i32_85 : i32
      %171 = arith.index_cast %170 : i32 to index
      %c0_86 = arith.constant 0 : index
      %c0_87 = arith.constant 0 : index
      %172 = vector.load %arg12[%171, %c0_86, %c0_87] : memref<32x8x128xf32, #tpu.memory_space<vmem>>, vector<1x8x128xf32>
      %173 = vector.shape_cast %172 : vector<1x8x128xf32> to vector<8x128xf32>
      %174 = arith.mulf %173, %167 : vector<8x128xf32>
      %c1_i32_88 = arith.constant 1 : i32
      %175 = arith.addi %157, %c1_i32_88 : i32
      %176 = arith.index_cast %175 : i32 to index
      %c0_89 = arith.constant 0 : index
      %c0_90 = arith.constant 0 : index
      %177 = vector.load %arg13[%176, %c0_89, %c0_90] : memref<32x8x128xf32, #tpu.memory_space<vmem>>, vector<1x8x128xf32>
      %178 = vector.shape_cast %177 : vector<1x8x128xf32> to vector<8x128xf32>
      %179 = arith.addf %174, %178 : vector<8x128xf32>
      %cst_91 = arith.constant dense<0.000000e+00> : vector<128xf32>
      %180 = vector.multi_reduction <add>, %179, %cst_91 [0] : vector<8x128xf32> to vector<128xf32>
      %181 = vector.shape_cast %180 : vector<128xf32> to vector<1x128xf32>
      %c2_i32_92 = arith.constant 2 : i32
      %182 = arith.addi %157, %c2_i32_92 : i32
      %183 = arith.index_cast %182 : i32 to index
      %c0_93 = arith.constant 0 : index
      %c0_94 = arith.constant 0 : index
      %184 = vector.load %arg12[%183, %c0_93, %c0_94] : memref<32x8x128xf32, #tpu.memory_space<vmem>>, vector<1x8x128xf32>
      %185 = vector.shape_cast %184 : vector<1x8x128xf32> to vector<8x128xf32>
      %186 = arith.mulf %185, %179 : vector<8x128xf32>
      %c2_i32_95 = arith.constant 2 : i32
      %187 = arith.addi %157, %c2_i32_95 : i32
      %188 = arith.index_cast %187 : i32 to index
      %c0_96 = arith.constant 0 : index
      %c0_97 = arith.constant 0 : index
      %189 = vector.load %arg13[%188, %c0_96, %c0_97] : memref<32x8x128xf32, #tpu.memory_space<vmem>>, vector<1x8x128xf32>
      %190 = vector.shape_cast %189 : vector<1x8x128xf32> to vector<8x128xf32>
      %191 = arith.addf %186, %190 : vector<8x128xf32>
      %cst_98 = arith.constant dense<0.000000e+00> : vector<128xf32>
      %192 = vector.multi_reduction <add>, %191, %cst_98 [0] : vector<8x128xf32> to vector<128xf32>
      %193 = vector.shape_cast %192 : vector<128xf32> to vector<1x128xf32>
      %c3_i32 = arith.constant 3 : i32
      %194 = arith.addi %157, %c3_i32 : i32
      %195 = arith.index_cast %194 : i32 to index
      %c0_99 = arith.constant 0 : index
      %c0_100 = arith.constant 0 : index
      %196 = vector.load %arg12[%195, %c0_99, %c0_100] : memref<32x8x128xf32, #tpu.memory_space<vmem>>, vector<1x8x128xf32>
      %197 = vector.shape_cast %196 : vector<1x8x128xf32> to vector<8x128xf32>
      %198 = arith.mulf %197, %191 : vector<8x128xf32>
      %c3_i32_101 = arith.constant 3 : i32
      %199 = arith.addi %157, %c3_i32_101 : i32
      %200 = arith.index_cast %199 : i32 to index
      %c0_102 = arith.constant 0 : index
      %c0_103 = arith.constant 0 : index
      %201 = vector.load %arg13[%200, %c0_102, %c0_103] : memref<32x8x128xf32, #tpu.memory_space<vmem>>, vector<1x8x128xf32>
      %202 = vector.shape_cast %201 : vector<1x8x128xf32> to vector<8x128xf32>
      %203 = arith.addf %198, %202 : vector<8x128xf32>
      %cst_104 = arith.constant dense<0.000000e+00> : vector<128xf32>
      %204 = vector.multi_reduction <add>, %203, %cst_104 [0] : vector<8x128xf32> to vector<128xf32>
      %205 = vector.shape_cast %204 : vector<128xf32> to vector<1x128xf32>
      %c4_i32 = arith.constant 4 : i32
      %206 = arith.addi %157, %c4_i32 : i32
      %207 = arith.index_cast %206 : i32 to index
      %c0_105 = arith.constant 0 : index
      %c0_106 = arith.constant 0 : index
      %208 = vector.load %arg12[%207, %c0_105, %c0_106] : memref<32x8x128xf32, #tpu.memory_space<vmem>>, vector<1x8x128xf32>
      %209 = vector.shape_cast %208 : vector<1x8x128xf32> to vector<8x128xf32>
      %210 = arith.mulf %209, %203 : vector<8x128xf32>
      %c4_i32_107 = arith.constant 4 : i32
      %211 = arith.addi %157, %c4_i32_107 : i32
      %212 = arith.index_cast %211 : i32 to index
      %c0_108 = arith.constant 0 : index
      %c0_109 = arith.constant 0 : index
      %213 = vector.load %arg13[%212, %c0_108, %c0_109] : memref<32x8x128xf32, #tpu.memory_space<vmem>>, vector<1x8x128xf32>
      %214 = vector.shape_cast %213 : vector<1x8x128xf32> to vector<8x128xf32>
      %215 = arith.addf %210, %214 : vector<8x128xf32>
      %cst_110 = arith.constant dense<0.000000e+00> : vector<128xf32>
      %216 = vector.multi_reduction <add>, %215, %cst_110 [0] : vector<8x128xf32> to vector<128xf32>
      %217 = vector.shape_cast %216 : vector<128xf32> to vector<1x128xf32>
      %c5_i32 = arith.constant 5 : i32
      %218 = arith.addi %157, %c5_i32 : i32
      %219 = arith.index_cast %218 : i32 to index
      %c0_111 = arith.constant 0 : index
      %c0_112 = arith.constant 0 : index
      %220 = vector.load %arg12[%219, %c0_111, %c0_112] : memref<32x8x128xf32, #tpu.memory_space<vmem>>, vector<1x8x128xf32>
      %221 = vector.shape_cast %220 : vector<1x8x128xf32> to vector<8x128xf32>
      %222 = arith.mulf %221, %215 : vector<8x128xf32>
      %c5_i32_113 = arith.constant 5 : i32
      %223 = arith.addi %157, %c5_i32_113 : i32
      %224 = arith.index_cast %223 : i32 to index
      %c0_114 = arith.constant 0 : index
      %c0_115 = arith.constant 0 : index
      %225 = vector.load %arg13[%224, %c0_114, %c0_115] : memref<32x8x128xf32, #tpu.memory_space<vmem>>, vector<1x8x128xf32>
      %226 = vector.shape_cast %225 : vector<1x8x128xf32> to vector<8x128xf32>
      %227 = arith.addf %222, %226 : vector<8x128xf32>
      %cst_116 = arith.constant dense<0.000000e+00> : vector<128xf32>
      %228 = vector.multi_reduction <add>, %227, %cst_116 [0] : vector<8x128xf32> to vector<128xf32>
      %229 = vector.shape_cast %228 : vector<128xf32> to vector<1x128xf32>
      %c6_i32 = arith.constant 6 : i32
      %230 = arith.addi %157, %c6_i32 : i32
      %231 = arith.index_cast %230 : i32 to index
      %c0_117 = arith.constant 0 : index
      %c0_118 = arith.constant 0 : index
      %232 = vector.load %arg12[%231, %c0_117, %c0_118] : memref<32x8x128xf32, #tpu.memory_space<vmem>>, vector<1x8x128xf32>
      %233 = vector.shape_cast %232 : vector<1x8x128xf32> to vector<8x128xf32>
      %234 = arith.mulf %233, %227 : vector<8x128xf32>
      %c6_i32_119 = arith.constant 6 : i32
      %235 = arith.addi %157, %c6_i32_119 : i32
      %236 = arith.index_cast %235 : i32 to index
      %c0_120 = arith.constant 0 : index
      %c0_121 = arith.constant 0 : index
      %237 = vector.load %arg13[%236, %c0_120, %c0_121] : memref<32x8x128xf32, #tpu.memory_space<vmem>>, vector<1x8x128xf32>
      %238 = vector.shape_cast %237 : vector<1x8x128xf32> to vector<8x128xf32>
      %239 = arith.addf %234, %238 : vector<8x128xf32>
      %cst_122 = arith.constant dense<0.000000e+00> : vector<128xf32>
      %240 = vector.multi_reduction <add>, %239, %cst_122 [0] : vector<8x128xf32> to vector<128xf32>
      %241 = vector.shape_cast %240 : vector<128xf32> to vector<1x128xf32>
      %c7_i32 = arith.constant 7 : i32
      %242 = arith.addi %157, %c7_i32 : i32
      %243 = arith.index_cast %242 : i32 to index
      %c0_123 = arith.constant 0 : index
      %c0_124 = arith.constant 0 : index
      %244 = vector.load %arg12[%243, %c0_123, %c0_124] : memref<32x8x128xf32, #tpu.memory_space<vmem>>, vector<1x8x128xf32>
      %245 = vector.shape_cast %244 : vector<1x8x128xf32> to vector<8x128xf32>
      %246 = arith.mulf %245, %239 : vector<8x128xf32>
      %c7_i32_125 = arith.constant 7 : i32
      %247 = arith.addi %157, %c7_i32_125 : i32
      %248 = arith.index_cast %247 : i32 to index
      %c0_126 = arith.constant 0 : index
      %c0_127 = arith.constant 0 : index
      %249 = vector.load %arg13[%248, %c0_126, %c0_127] : memref<32x8x128xf32, #tpu.memory_space<vmem>>, vector<1x8x128xf32>
      %250 = vector.shape_cast %249 : vector<1x8x128xf32> to vector<8x128xf32>
      %251 = arith.addf %246, %250 : vector<8x128xf32>
      %cst_128 = arith.constant dense<0.000000e+00> : vector<128xf32>
      %252 = vector.multi_reduction <add>, %251, %cst_128 [0] : vector<8x128xf32> to vector<128xf32>
      %253 = vector.shape_cast %252 : vector<128xf32> to vector<1x128xf32>
      %254 = tpu.concatenate %169, %181, %193, %205, %217, %229, %241, %253 in 0 : vector<1x128xf32>, vector<1x128xf32>, vector<1x128xf32>, vector<1x128xf32>, vector<1x128xf32>, vector<1x128xf32>, vector<1x128xf32>, vector<1x128xf32> -> vector<8x128xf32>
      %255 = arith.index_cast %157 : i32 to index
      %c0_129 = arith.constant 0 : index
      %256 = vector.load %arg14[%255, %c0_129] : memref<32x128xf32, #tpu.memory_space<vmem>>, vector<8x128xf32>
      tpu.vector_store %arg14[%255, %c0_129], %254 {strides = array<i32>} : memref<32x128xf32, #tpu.memory_space<vmem>>, vector<8x128xf32>,
      scf.yield %251 : vector<8x128xf32>
    }
    %c2_i32_62 = arith.constant 2 : i32
    %c0_63 = arith.constant 0 : index
    %c0_64 = arith.constant 0 : index
    %137 = vector.load %arg14[%c0_63, %c0_64] : memref<32x128xf32, #tpu.memory_space<vmem>>, vector<32x128xf32>
    %c0_65 = arith.constant 0 : index
    %c8 = arith.constant 8 : index
    %c0_66 = arith.constant 0 : index
    %138 = vector.load %arg3[%c0_65, %c8, %c0_66] : memref<1x16x128xf32, #tpu.memory_space<vmem>>, vector<1x1x128xf32>
    %139 = vector.shape_cast %138 : vector<1x1x128xf32> to vector<1x128xf32>
    %140 = vector.broadcast %139 : vector<1x128xf32> to vector<32x128xf32>
    %141 = arith.mulf %80, %140 : vector<32x128xf32>
    %142 = arith.addf %137, %141 : vector<32x128xf32>
    %143 = arith.truncf %142 : vector<32x128xf32> to vector<32x128xbf16>
    %c0_67 = arith.constant 0 : index
    %c0_68 = arith.constant 0 : index
    %c0_69 = arith.constant 0 : index
    %144 = vector.load %arg8[%c0_67, %c0_68, %c0_69] : memref<1x128x128xbf16, #tpu.memory_space<vmem>>, vector<1x128x128xbf16>
    %145 = vector.shape_cast %144 : vector<1x128x128xbf16> to vector<128x128xbf16>
    %cst_70 = arith.constant dense<0.000000e+00> : vector<32x128xf32>
    %146 = tpu.matmul %143, %145, %cst_70 {dimension_numbers = #tpu.dot_dimension_numbers<[1], [0], [0], [1], [0, 0, 1, 1], [], []>} : vector<32x128xbf16>, vector<128x128xbf16>, vector<32x128xf32> -> vector<32x128xf32>
    %c0_71 = arith.constant 0 : index
    %c9 = arith.constant 9 : index
    %c0_72 = arith.constant 0 : index
    %147 = vector.load %arg3[%c0_71, %c9, %c0_72] : memref<1x16x128xf32, #tpu.memory_space<vmem>>, vector<1x1x128xf32>
    %148 = vector.shape_cast %147 : vector<1x1x128xf32> to vector<1x128xf32>
    %149 = vector.broadcast %148 : vector<1x128xf32> to vector<32x128xf32>
    %150 = arith.addf %146, %149 : vector<32x128xf32>
    %c0_73 = arith.constant 0 : index
    %c0_74 = arith.constant 0 : index
    %151 = vector.load %arg11[%c0_73, %c0_74] : memref<32x128xf32, #tpu.memory_space<vmem>>, vector<32x128xf32>
    tpu.vector_store %arg11[%c0_73, %c0_74], %150 {strides = array<i32>} : memref<32x128xf32, #tpu.memory_space<vmem>>, vector<32x128xf32>,
    %c1_i32_75 = arith.constant 1 : i32
    %152 = arith.cmpi eq, %arg1, %c1_i32_75 : i32
    %153 = arith.extui %152 : i1 to i32
    %c0_i32_76 = arith.constant 0 : i32
    %154 = arith.cmpi ne, %153, %c0_i32_76 : i32
    scf.if %154 {
      %c0_77 = arith.constant 0 : index
      %c0_78 = arith.constant 0 : index
      %155 = vector.load %arg11[%c0_77, %c0_78] : memref<32x128xf32, #tpu.memory_space<vmem>>, vector<32x128xf32>
      %156 = arith.mulf %155, %155 : vector<32x128xf32>
      %cst_79 = arith.constant dense<0.000000e+00> : vector<32xf32>
      %157 = vector.multi_reduction <add>, %156, %cst_79 [1] : vector<32x128xf32> to vector<32xf32>
      %158 = vector.shape_cast %157 : vector<32xf32> to vector<32x1xf32>
      %cst_80 = arith.constant 3.125000e-02 : f32
      %159 = vector.broadcast %cst_80 : f32 to vector<32x1xf32>
      %160 = arith.mulf %158, %159 : vector<32x1xf32>
      %cst_81 = arith.constant 9.99999974E-6 : f32
      %161 = vector.broadcast %cst_81 : f32 to vector<32x1xf32>
      %162 = arith.addf %160, %161 : vector<32x1xf32>
      %163 = math.rsqrt %162 : vector<32x1xf32>
      %164 = vector.broadcast %163 : vector<32x1xf32> to vector<32x128xf32>
      %165 = arith.mulf %155, %164 : vector<32x128xf32>
      %c0_82 = arith.constant 0 : index
      %c0_83 = arith.constant 0 : index
      %166 = vector.load %arg9[%c0_82, %c0_83] : memref<1x128xf32, #tpu.memory_space<vmem>>, vector<1x128xf32>
      %167 = vector.broadcast %166 : vector<1x128xf32> to vector<32x128xf32>
      %168 = arith.mulf %165, %167 : vector<32x128xf32>
      %169 = vector.extract_strided_slice %168 {offsets = [0, 0], sizes = [16, 128], strides = [1, 1]} : vector<32x128xf32> to vector<16x128xf32>
      %cst_84 = arith.constant dense<0.000000e+00> : vector<128xf32>
      %170 = vector.multi_reduction <add>, %169, %cst_84 [0] : vector<16x128xf32> to vector<128xf32>
      %171 = vector.shape_cast %170 : vector<128xf32> to vector<1x128xf32>
      %cst_85 = arith.constant 1.600000e+01 : f32
      %172 = vector.broadcast %cst_85 : f32 to vector<1x128xf32>
      %173 = arith.divf %171, %172 : vector<1x128xf32>
      %174 = vector.extract_strided_slice %168 {offsets = [16, 0], sizes = [16, 128], strides = [1, 1]} : vector<32x128xf32> to vector<16x128xf32>
      %cst_86 = arith.constant dense<0.000000e+00> : vector<128xf32>
      %175 = vector.multi_reduction <add>, %174, %cst_86 [0] : vector<16x128xf32> to vector<128xf32>
      %176 = vector.shape_cast %175 : vector<128xf32> to vector<1x128xf32>
      %cst_87 = arith.constant 1.600000e+01 : f32
      %177 = vector.broadcast %cst_87 : f32 to vector<1x128xf32>
      %178 = arith.divf %176, %177 : vector<1x128xf32>
      %179 = tpu.concatenate %173, %178 in 0 : vector<1x128xf32>, vector<1x128xf32> -> vector<2x128xf32>
      %c0_88 = arith.constant 0 : index
      %c0_89 = arith.constant 0 : index
      %c0_90 = arith.constant 0 : index
      %180 = vector.load %arg10[%c0_88, %c0_89, %c0_90] : memref<1x2x128xf32, #tpu.memory_space<vmem>>, vector<1x2x128xf32>
      %181 = vector.shape_cast %180 : vector<1x2x128xf32> to vector<2x128xf32>
      %182 = vector.shape_cast %179 : vector<2x128xf32> to vector<1x2x128xf32>
      tpu.vector_store %arg10[%c0_88, %c0_89, %c0_90], %182 {strides = array<i32>} : memref<1x2x128xf32, #tpu.memory_space<vmem>>, vector<1x2x128xf32>,
    } else {
    }
    return
  }
  func.func @transform_0(%arg0: i32, %arg1: i32) -> (i32, i32, i32) {
    %c0_i32 = arith.constant 0 : i32
    %c0_i32_0 = arith.constant 0 : i32
    %c0_i32_1 = arith.constant 0 : i32
    return %arg0, %c0_i32, %c0_i32_0 : i32, i32, i32
  }
  func.func @transform_1(%arg0: i32, %arg1: i32) -> (i32, i32, i32) {
    %c0_i32 = arith.constant 0 : i32
    %c0_i32_0 = arith.constant 0 : i32
    %c0_i32_1 = arith.constant 0 : i32
    return %arg1, %c0_i32, %c0_i32_0 : i32, i32, i32
  }
  func.func @transform_2(%arg0: i32, %arg1: i32) -> (i32, i32, i32) {
    %c0_i32 = arith.constant 0 : i32
    %c0_i32_0 = arith.constant 0 : i32
    %c0_i32_1 = arith.constant 0 : i32
    return %arg1, %c0_i32, %c0_i32_0 : i32, i32, i32
  }
  func.func @transform_3(%arg0: i32, %arg1: i32) -> (i32, i32, i32) {
    %c0_i32 = arith.constant 0 : i32
    %c0_i32_0 = arith.constant 0 : i32
    %c0_i32_1 = arith.constant 0 : i32
    return %arg1, %c0_i32, %c0_i32_0 : i32, i32, i32
  }
  func.func @transform_4(%arg0: i32, %arg1: i32) -> (i32, i32, i32) {
    %c0_i32 = arith.constant 0 : i32
    %c0_i32_0 = arith.constant 0 : i32
    %c0_i32_1 = arith.constant 0 : i32
    return %arg1, %c0_i32, %c0_i32_0 : i32, i32, i32
  }
  func.func @transform_5(%arg0: i32, %arg1: i32) -> (i32, i32, i32) {
    %c0_i32 = arith.constant 0 : i32
    %c0_i32_0 = arith.constant 0 : i32
    %c0_i32_1 = arith.constant 0 : i32
    return %arg1, %c0_i32, %c0_i32_0 : i32, i32, i32
  }
  func.func @transform_6(%arg0: i32, %arg1: i32) -> (i32, i32, i32) {
    %c0_i32 = arith.constant 0 : i32
    %c0_i32_0 = arith.constant 0 : i32
    %c0_i32_1 = arith.constant 0 : i32
    return %arg1, %c0_i32, %c0_i32_0 : i32, i32, i32
  }
  func.func @transform_7(%arg0: i32, %arg1: i32) -> (i32, i32) {
    %c0_i32 = arith.constant 0 : i32
    %c0_i32_0 = arith.constant 0 : i32
    %c0_i32_1 = arith.constant 0 : i32
    return %c0_i32, %c0_i32_0 : i32, i32
  }
  func.func @transform_8(%arg0: i32, %arg1: i32) -> (i32, i32, i32) {
    %c0_i32 = arith.constant 0 : i32
    %c0_i32_0 = arith.constant 0 : i32
    %c0_i32_1 = arith.constant 0 : i32
    return %arg0, %c0_i32, %c0_i32_0 : i32, i32, i32
  }
}

</mosaic_0001>

<bundles_post_ra>
// kernel: tpu_custom_call.1
= control target key start
LH: loop header
LB: loop body
LE: loop exit
PB: predicated region body
PF: predicated region fallthrough
CT: control target
= control target key end

     0   :  { %s5069_s0 = inlined_call_operand.hbm [shape: f32[2,16,128], index: 0, kind: input, shape index: {}]   ;;  %s5070_s1 = inlined_call_operand.hbm [shape: f32[2,16,128], index: 1, kind: input, shape index: {}]   ;;  %s5071_s2 = inlined_call_operand.hbm [shape: bf16[2,128,128], index: 2, kind: input, shape index: {}]   ;;  %s5072_s3 = inlined_call_operand.hbm [shape: bf16[2,128,128], index: 3, kind: input, shape index: {}]   ;;  %s5073_s4 = inlined_call_operand.hbm [shape: bf16[2,128,128], index: 4, kind: input, shape index: {}]   ;;  %s5074_s5 = inlined_call_operand.hbm [shape: f32[2,8,128], index: 5, kind: input, shape index: {}]   ;;  %s5075_s6 = inlined_call_operand.hbm [shape: bf16[2,128,128], index: 6, kind: input, shape index: {}]   ;;  %s5076_s7 = inlined_call_operand.vmem [shape: f32[1,128], index: 7, kind: input, shape index: {}]   ;;  %s5077_s8 = inlined_call_operand.hbm [shape: f32[1,2,128], index: 8, kind: output, shape index: {}]  }
   0x1   :  { %5085 = sst [smem:[#allocation28_spill]] %s5070_s1 }
   0x2   :  { %5086 = sst [smem:[#allocation29_spill]] %s5075_s6 }
   0x3   :  { %5087 = sst [smem:[#allocation30_spill]] %s5076_s7 }
   0x4   :  { %5088 = sst [smem:[#allocation31_spill]] %s5077_s8 }
   0x5   :  { %13 = vsyncpa [#allocation7], 0 }
   0x6   :  { %14 = vsyncpa [#allocation10], 0 }
   0x7   :  { %16 = vsyncpa [#allocation10 + $0x1], 0 }
   0x8   :  { %17 = vsyncpa [#allocation13], 0 }
   0x9   :  { %19 = vsyncpa [#allocation13 + $0x1], 0 }
   0xa   :  { %20 = vsyncpa [#allocation16], 0 }
   0xb   :  { %22 = vsyncpa [#allocation16 + $0x1], 0 }
   0xc   :  { %23 = vsyncpa [#allocation8], 0  ;;  %s4183_s27 = smov 0   ;;  %s4185_s28 = smov 0  }
   0xd   :  { %s4187_s29 = smov 0   ;;  %s4189_s30 = smov 0  }
   0xe   :  { %s4191_s9 = smov 0   ;;  %s4193_s10 = smov 0  }
   0xf LB: > { %5089 = sst [smem:[#allocation24_spill]] %s4095_s29  ;;  %s38_s11 = sadd.s32 1, %s4103_s9  ;;  %s4107_s10 = sphi %s4193_s10, %s29_s10   ;;  %s4103_s9 = sphi %s4191_s9, %s5130_s9   ;;  %s4099_s30 = sphi %s4189_s30, %s5129_s30   ;;  %s4095_s29 = sphi %s4187_s29, %s5125_s29   ;;  %s4091_s28 = sphi %s4185_s28, %s5128_s28   ;;  %s4087_s27 = sphi %s4183_s27, %s5127_s27  }
  0x10   : > { %5090 = sst [smem:[#allocation25_spill]] %s4099_s30  ;;  %s74_s12 = sadd.s32 1, %s4095_s29 }
  0x11   : > { %p39_p0 = scmp.ge.s32.totalorder %s38_s11, 2  ;;  %p81_p1 = scmp.ne.s32.totalorder %s4095_s29, %s4091_s28 }
  0x12   : > { %p82_p2 = scmp.eq.s32.totalorder %s4107_s10, 0  ;;  %p3570_p5 = scmp.lt.s32.totalorder %s4107_s10, 2 }
  0x13   : > { %s5132_s11 = smov (%p39_p0, %s38_s11), 0  ;;  %s4228_s15 = sand.u32 1, %s4107_s10  }
  0x14   : > { %5091 = sst [smem:[#allocation26_spill]] %s5132_s11  ;;  %p4220_p3 = por %p82_p2, %p81_p1 }
  0x15   : > { %s71_s14 = ssub.s32 %s4103_s9, %s5132_s11  ;;  %s4231_s16 = sand.u32 1, %s4095_s29  }
  0x16   : > { %p72_p4 = scmp.eq.s32.totalorder %s71_s14, 0  ;;  %s3198_s18 = sshll.u32 %s4231_s16, 4 }
  0x17   : > { %s3370_s19 = sshll.u32 %s4103_s9, 8  ;;  %s5094_s1 = sld [smem:[#allocation28_spill]] }
  0x18   : > { %s4234_s17 = scalar_select %p72_p4, %s4095_s29, %s74_s12  }
  0x19   : > { %s312_s23 = scalar_lea.vmem [#allocation9], %s3198_s18  ;;  %p4243_p6 = pnand %p3570_p5, %p4220_p3 }
  0x1a   : > { %5093 = sst [smem:[#allocation27_spill]] %s4234_s17  ;;  %s319_s24 = sshll.u32 %s312_s23, 4  ;;  %s320_s24 = int_to_ptr.vmem [resolvable:$true] %s319_s24 }
  0x1b   : > { %s4248_s26 = sshll.u32 %s4231_s16, 6  ;;  %s4251_s14 = sshll.u32 %s4103_s9, 10 }
  0x1c   : > { %s5082_s12 = scalar_lea.sflag [#allocation10], %s4228_s15  ;;  %p4256_p7 = pneg %p4243_p6 }
  0x1d   : > { %s318_s22 = scalar_lea.hbm %s5094_s1, %s3370_s19  ;;  %s3820_s18 = scalar_lea.vmem %s320_s24, 256 }
  0x1e   : > { %p3821_p8 = scmp.ne.s32.totalorder %s320_s24, %s3820_s18  ;;  %s4125_s13 = smov [#allocation9]  }
  0x1f   : > { %s3825_s19 = sshll.u32 %s4125_s13, 4  ;;  %s3826_s19 = int_to_ptr.vmem [resolvable:$false] %s3825_s19 }
  0x20   : > { %p3823_p9 = pnand %p3821_p8, %p4256_p7  ;;  %s3827_s20 = scalar_lea.vmem %s3826_s19, 512 }
  0x21   : > { %p3828_p11 = scmp.lt.s32.totalorder %s320_s24, %s3826_s19  ;;  %p3829_p12 = scmp.lt.s32.totalorder %s3827_s20, %s3820_s18 }
  0x22   : > { %p3824_p10 = pneg %p3823_p9 }
  0x23   : > { %p3830_p13 = por %p3829_p12, %p3828_p11 }
  0x25   : > { %p3831_p0 = pnand %p3830_p13, %p3824_p10 }
  0x27   : > { %3834 = shalt.err (!%p3831_p0)
}
  0x28   : > { %s5080_s21 = smov 128   ;;  %s5081_s23 = smov 8  }
  0x29   : > { %3553 = dma.hbm_to_vmem [thread:$0]  (!%p4243_p6), %s318_s22, 256, %s320_s24, %s5082_s12, %s5080_s21, %s5080_s21, %s5081_s23  }
  0x2a   : > { %s360_s19 = scalar_lea.hbm %s5072_s3, %s4251_s14  ;;  %s354_s20 = scalar_lea.vmem [#allocation12], %s4248_s26 }
  0x2b   : > { %s361_s1 = sshll.u32 %s354_s20, 4  ;;  %s3210_s17 = sshll.u32 %s4231_s16, 3  ;;  %s362_s1 = int_to_ptr.vmem [resolvable:$true] %s361_s1 }
  0x2c   : > { %s5084_s29 = scalar_lea.sflag [#allocation13], %s4228_s15  ;;  %s3848_s8 = scalar_lea.vmem %s362_s1, 1024 }
  0x2d   : > { %p3849_p1 = scmp.ne.s32.totalorder %s362_s1, %s3848_s8  ;;  %s4128_s7 = smov [#allocation12]  }
  0x2e   : > { %s3853_s30 = sshll.u32 %s4128_s7, 4  ;;  %s3854_s30 = int_to_ptr.vmem [resolvable:$false] %s3853_s30 }
  0x2f   : > { %p3851_p2 = pnand %p3849_p1, %p4256_p7  ;;  %s3855_s6 = scalar_lea.vmem %s3854_s30, 2048 }
  0x30   : > { %p3856_p4 = scmp.lt.s32.totalorder %s362_s1, %s3854_s30  ;;  %p3857_p5 = scmp.lt.s32.totalorder %s3855_s6, %s3848_s8 }
  0x31   : > { %p3852_p3 = pneg %p3851_p2 }
  0x32   : > { %p3858_p8 = por %p3857_p5, %p3856_p4 }
  0x34   : > { %p3859_p9 = pnand %p3858_p8, %p3852_p3 }
  0x36   : > { %3862 = shalt.err (!%p3859_p9)
}
  0x37   : > { %s4129_s22 = smov 64   ;;  %s4130_s16 = smov 4  }
  0x38   : > { %3559 = dma.hbm_to_vmem [thread:$0]  (!%p4243_p6), %s360_s19, 1024, %s362_s1, %s5084_s29, %s4129_s22, %s4129_s22, %s4130_s16  }
  0x39   : > { %s3211_s7 = sshll.u32 %s4103_s9, 7  ;;  %s396_s8 = scalar_lea.vmem [#allocation15], %s3210_s17 }
  0x3a   : > { %s401_s6 = scalar_lea.hbm %s5074_s5, %s3211_s7  ;;  %s403_s13 = sshll.u32 %s396_s8, 4  ;;  %s404_s13 = int_to_ptr.vmem [resolvable:$true] %s403_s13 }
  0x3b   : > { %s5083_s18 = scalar_lea.sflag [#allocation16], %s4228_s15  ;;  %s3876_s20 = scalar_lea.vmem %s404_s13, 128 }
  0x3c   : > { %p3877_p10 = scmp.ne.s32.totalorder %s404_s13, %s3876_s20  ;;  %s4131_s21 = smov [#allocation15]  }
  0x3d   : > { %s3881_s23 = sshll.u32 %s4131_s21, 4  ;;  %s3882_s23 = int_to_ptr.vmem [resolvable:$false] %s3881_s23 }
  0x3e   : > { %p3879_p11 = pnand %p3877_p10, %p4256_p7  ;;  %s3883_s12 = scalar_lea.vmem %s3882_s23, 256 }
  0x3f   : > { %p3884_p13 = scmp.lt.s32.totalorder %s404_s13, %s3882_s23  ;;  %p3885_p0 = scmp.lt.s32.totalorder %s3883_s12, %s3876_s20 }
  0x40   : > { %p3880_p12 = pneg %p3879_p11 }
  0x41   : > { %p3886_p1 = por %p3885_p0, %p3884_p13 }
  0x43   : > { %p3887_p2 = pnand %p3886_p1, %p3880_p12 }
  0x45   : > { %3890 = shalt.err (!%p3887_p2)
}
  0x46   : > { %3565 = dma.hbm_to_vmem [thread:$0]  (!%p4243_p6), %s401_s6, 128, %s404_s13, %s5083_s18  }
  0x47   : > { %s4297_s1 = sadd.s32 4294967295, %s4107_s10   ;;  %p87_p3 = scmp.ne.s32.totalorder %s4091_s28, %s4087_s27 }
  0x48   : > { %p88_p4 = scmp.eq.s32.totalorder %s4297_s1, 0  ;;  %p3195_p5 = scmp.ge.s32.totalorder %s4107_s10, 1 }
  0x49   : > { %p275_p8 = scmp.lt.s32.totalorder %s4107_s10, 3  ;;  %s4132_s21 = smov [#allocation6]  }
  0x4a   : > { %p4306_p9 = por %p88_p4, %p87_p3  ;;  %s291_s23 = sshll.u32 %s4132_s21, 4  ;;  %s4316_s23 = int_to_ptr.vmem [resolvable:$true] %s291_s23 }
  0x4b   : > { %p4310_p10 = pnand %p3195_p5, %p275_p8  ;;  %s339_s7 = scalar_lea.hbm %s5071_s2, %s4251_s14 }
  0x4c   : > { %s333_s24 = scalar_lea.vmem [#allocation11], %s4248_s26  ;;  %s4133_s13 = smov [#allocation11]  }
  0x4d   : > { %p3546_p11 = pneg %p4310_p10  ;;  %s340_s30 = sshll.u32 %s333_s24, 4  ;;  %s341_s30 = int_to_ptr.vmem [resolvable:$true] %s340_s30 }
  0x4e   : > { %s3904_s8 = scalar_lea.vmem %s341_s30, 1024  ;;  %s3909_s20 = sshll.u32 %s4133_s13, 4  ;;  %s3910_s20 = int_to_ptr.vmem [resolvable:$false] %s3909_s20 }
  0x4f   : > { %p4325_p12 = pnand %p3546_p11, %p88_p4  ;;  %p3905_p13 = scmp.ne.s32.totalorder %s341_s30, %s3904_s8 }
  0x50   : > { %s3911_s21 = scalar_lea.vmem %s3910_s20, 2048  ;;  %p3912_p2 = scmp.lt.s32.totalorder %s341_s30, %s3910_s20 }
  0x51   : > { %p3907_p0 = pnand %p3905_p13, %p4256_p7  ;;  %p3913_p3 = scmp.lt.s32.totalorder %s3911_s21, %s3904_s8 }
  0x53   : > { %p3908_p1 = pneg %p3907_p0  ;;  %p3914_p5 = por %p3913_p3, %p3912_p2 }
  0x55   : > { %p3915_p8 = pnand %p3914_p5, %p3908_p1 }
  0x57   : > { %3918 = shalt.err (!%p3915_p8)
}
  0x58   : > { %s5100_s27 = scalar_lea.sflag [#allocation10], %s4228_s15  ;;  %p3921_p11 = pneg %p4325_p12 }
  0x59   : > { %3556 = dma.hbm_to_vmem [thread:$0]  (!%p4243_p6), %s339_s7, 1024, %s341_s30, %s5100_s27, %s4129_s22, %s4129_s22, %s4130_s16  }
  0x5a   : > { %s3930_s19 = scalar_lea.vmem %s4316_s23, 512  ;;  %p3938_p1 = scmp.lt.s32.totalorder %s4316_s23, %s4316_s23 }
  0x5b   : > { %p3931_p13 = scmp.ne.s32.totalorder %s4316_s23, %s3930_s19  ;;  %p3939_p3 = scmp.lt.s32.totalorder %s3930_s19, %s3930_s19 }
  0x5d   : > { %p3933_p0 = pnand %p3931_p13, %p3921_p11  ;;  %p3940_p5 = por %p3939_p3, %p3938_p1 }
  0x5f   : > { %p3934_p2 = pneg %p3933_p0 }
  0x61   : > { %p3941_p8 = pnand %p3940_p5, %p3934_p2 }
  0x63   : > { %3944 = shalt.err (!%p3941_p8)
}
  0x64   : > { %s5101_s24 = smov 8   ;;  %s5102_s8 = smov 128  }
  0x65   : > { %3549 = dma.hbm_to_vmem [thread:$0]  (!%p4325_p12), %s5069_s0, 512, %s4316_s23, [#allocation7], %s5102_s8, %s5102_s8, %s5101_s24  }
  0x66   : > { %s381_s21 = scalar_lea.hbm %s5073_s4, %s4251_s14  ;;  %s375_s27 = scalar_lea.vmem [#allocation14], %s4248_s26 }
  0x67   : > { %s382_s19 = sshll.u32 %s375_s27, 4  ;;  %s4134_s6 = smov [#allocation14]   ;;  %s383_s19 = int_to_ptr.vmem [resolvable:$true] %s382_s19 }
  0x68   : > { %s3958_s18 = scalar_lea.vmem %s383_s19, 1024  ;;  %s3963_s29 = sshll.u32 %s4134_s6, 4  ;;  %s3964_s29 = int_to_ptr.vmem [resolvable:$false] %s3963_s29 }
  0x69   : > { %p3959_p11 = scmp.ne.s32.totalorder %s383_s19, %s3958_s18  ;;  %s3965_s13 = scalar_lea.vmem %s3964_s29, 2048 }
  0x6a   : > { %p3966_p2 = scmp.lt.s32.totalorder %s383_s19, %s3964_s29  ;;  %p3967_p1 = scmp.lt.s32.totalorder %s3965_s13, %s3958_s18 }
  0x6b   : > { %p3961_p13 = pnand %p3959_p11, %p4256_p7 }
  0x6c   : > { %p3968_p3 = por %p3967_p1, %p3966_p2 }
  0x6d   : > { %p3962_p0 = pneg %p3961_p13 }
  0x6f   : > { %p3969_p12 = pnand %p3968_p3, %p3962_p0 }
  0x71   : > { %3972 = shalt.err (!%p3969_p12)
}
  0x72   : > { %s5103_s23 = scalar_lea.sflag [#allocation13], %s4228_s15  ;;  %s5104_s7 = sld [smem:[#allocation29_spill]] }
  0x73   : > { %3562 = dma.hbm_to_vmem [thread:$0]  (!%p4243_p6), %s381_s21, 1024, %s383_s19, %s5103_s23, %s4129_s22, %s4129_s22, %s4130_s16  }
  0x74   : > { %s414_s29 = scalar_lea.vmem [#allocation17], %s4248_s26  ;;  %s4135_s27 = smov [#allocation17]  }
  0x75   : > { %s421_s18 = sshll.u32 %s414_s29, 4  ;;  %s3991_s6 = sshll.u32 %s4135_s27, 4  ;;  %s422_s18 = int_to_ptr.vmem [resolvable:$true] %s421_s18  ;;  %s3992_s6 = int_to_ptr.vmem [resolvable:$false] %s3991_s6 }
  0x76   : > { %s3986_s20 = scalar_lea.vmem %s422_s18, 1024  ;;  %s3993_s13 = scalar_lea.vmem %s3992_s6, 2048 }
  0x77   : > { %p3987_p5 = scmp.ne.s32.totalorder %s422_s18, %s3986_s20  ;;  %p3994_p13 = scmp.lt.s32.totalorder %s422_s18, %s3992_s6 }
  0x78   : > { %s420_s30 = scalar_lea.hbm %s5104_s7, %s4251_s14  ;;  %p3995_p0 = scmp.lt.s32.totalorder %s3993_s13, %s3986_s20 }
  0x79   : > { %p3989_p8 = pnand %p3987_p5, %p4256_p7 }
  0x7a   : > { %p3996_p2 = por %p3995_p0, %p3994_p13 }
  0x7b   : > { %p3990_p11 = pneg %p3989_p8 }
  0x7d   : > { %p3997_p1 = pnand %p3996_p2, %p3990_p11 }
  0x7f   : > { %4000 = shalt.err (!%p3997_p1)
}
  0x80   : > { %s5105_s26 = scalar_lea.sflag [#allocation16], %s4228_s15  ;;  %433 = sbr.rel (%p4310_p10) target bundleno = 1645 (0x66d), region = 52 }
  0x81   : > { %3568 = dma.hbm_to_vmem [thread:$0]  (!%p4243_p6), %s420_s30, 1024, %s422_s18, %s5105_s26, %s4129_s22, %s4129_s22, %s4130_s16  }
  0x85   : > { %4066 = dma.done.wait (%p88_p4), [#allocation7], 512  }
  0x86   : > { %4068 = vsyncadd (%p88_p4), [#allocation7], 4294966784  ;;  %s439_s11 = sand.u32 1, %s4297_s1   ;;  %s441_s25 = sand.u32 1, %s4091_s28  }
  0x87   : > { %s3217_s14 = sshll.u32 %s441_s25, 4  ;;  %s440_s21 = scalar_lea.sflag [#allocation10], %s439_s11 }
  0x88   : > { %s4389_s19 = scalar_lea.vmem [#allocation9], %s3217_s14 }
  0x89   : > { %4070 = dma.done.wait (%p4306_p9), %s440_s21, 1280  }
  0x8a   : > { %4072 = vsyncadd (%p4306_p9), %s440_s21, 4294966016  ;;  %s3218_s15 = sshll.u32 %s441_s25, 6  ;;  %s458_s16 = scalar_lea.sflag [#allocation13], %s439_s11 }
  0x8b   : > { %s4395_s22 = scalar_lea.vmem [#allocation11], %s3218_s15  ;;  %s4397_s12 = scalar_lea.vmem [#allocation12], %s3218_s15 }
  0x8c   : > { %4074 = dma.done.wait (%p4306_p9), %s458_s16, 2048  }
  0x8d   : > { %4076 = vsyncadd (%p4306_p9), %s458_s16, 4294965248  ;;  %s3221_s23 = sshll.u32 %s441_s25, 3  ;;  %s4403_s24 = scalar_lea.vmem [#allocation14], %s3218_s15 }
  0x8e   : > { %s476_s8 = scalar_lea.sflag [#allocation16], %s439_s11  ;;  %s4405_s7 = scalar_lea.vmem [#allocation15], %s3221_s23 }
  0x8f   : > { %4078 = dma.done.wait (%p4306_p9), %s476_s8, 1152  }
  0x90   : > { %4080 = vsyncadd (%p4306_p9), %s476_s8, 4294966144  ;;  %s4411_s30 = scalar_lea.vmem [#allocation17], %s3218_s15  ;;  %s5106_s29 = sld [smem:[#allocation25_spill]] }
  0x96   : > { %p3223_p6 = scmp.ne.s32.totalorder %s5106_s29, 0 }
  0x98   : > { %546 = sbr.rel (%p3223_p6) target bundleno = 160 (0xa0), region = 84 }
  0x9d   : > { %v547_v0 = vld [vmem:[#allocation6] sm:$0xff]  ;;  %v548_v1 = vld [vmem:[#allocation6 + $0x8] sm:$0xff]  ;;  %v552_v2 = vld [vmem:[#allocation6 + $0x10] sm:$0xff] }
  0x9e   : > { %549 = vst [vmem:[#allocation2 + $0x10] sm:$0xff] %v547_v0  ;;  %550 = vst [vmem:[#allocation2] sm:$0xff] %v548_v1  ;;  %v553_v3 = vld [vmem:[#allocation6 + $0x18] sm:$0xff] }
  0x9f   : > { %554 = vst [vmem:[#allocation2 + $0x18] sm:$0xff] %v552_v2  ;;  %555 = vst [vmem:[#allocation2 + $0x8] sm:$0xff] %v553_v3 }
  0xa0 PF: > { %v3661_v10 = vld [vmem:[%s4395_s22 + $0x38] sm:$0xff]   ;;  %v3662_v13 = vld [vmem:[%s4395_s22 + $0x30] sm:$0xff]   ;;  %v3663_v14 = vld [vmem:[%s4395_s22 + $0x28] sm:$0xff]   ;;  %v717_v60 = vlaneseq  ;;  %s4938_s17 = smov 0  }
  0xa1   : > { %3446 = vmatprep.subr.bf16.mxu0 %v3661_v10  ;;  %v3664_v15 = vld [vmem:[%s4395_s22 + $0x20] sm:$0xff]   ;;  %v3665_v16 = vld [vmem:[%s4395_s22 + $0x18] sm:$0xff]   ;;  %v3666_v17 = vld [vmem:[%s4395_s22 + $0x10] sm:$0xff]  }
  0xa2   : > { %3447 = vmatpush3.bf16.msra.mxu0 %v3661_v10  ;;  %v3667_v18 = vld [vmem:[%s4395_s22 + $0x8] sm:$0xff]   ;;  %v3668_v19 = vld [vmem:[%s4395_s22] sm:$0xff]   ;;  %v3669_v47 = vld [vmem:[%s4397_s12 + $0x38] sm:$0xff]   ;;  %v4436_v61 = vshrl.u32 %v717_v60, 7 }
  0xa3   : > { %3448 = vmatprep.subr.bf16.mxu0 %v3662_v13  ;;  %v3224_v37 = vld [vmem:[%s4389_s19] ss:$0 sm:$0xff]  ;;  %3466 = vmatprep.subr.bf16.mxu1 %v3669_v47  ;;  %v3671_v49 = vld [vmem:[%s4397_s12 + $0x28] sm:$0xff]   ;;  %v3673_v51 = vld [vmem:[%s4397_s12 + $0x18] sm:$0xff]  }
  0xa4   : > { %v3670_v48 = vld [vmem:[%s4397_s12 + $0x30] sm:$0xff]   ;;  %3467 = vmatpush3.bf16.msra.mxu1 %v3669_v47  ;;  %v3672_v50 = vld [vmem:[%s4397_s12 + $0x20] sm:$0xff]   ;;  %v3675_v53 = vld [vmem:[%s4397_s12 + $0x8] sm:$0xff]   ;;  %v721_v62 = vadd.s32 24, %v4436_v61  ;;  %v720_v1 = vadd.s32 16, %v4436_v61  ;;  %v719_v2 = vadd.s32 8, %v4436_v61 }
  0xa5   : > { %v556_v5 = vld [vmem:[#allocation2 + $0x10] sm:$0xff]  ;;  %v557_v9 = vld [vmem:[#allocation2] sm:$0xff]  ;;  %3468 = vmatprep.subr.bf16.mxu1 %v3670_v48  ;;  %v3677_v55 = vld [vmem:[%s4403_s24 + $0x38] sm:$0xff]   ;;  %v726_v3 = vand.u32 15, %v4436_v61  ;;  %vm778_vm1 = vcmp.lt.s32.totalorder %v4436_v61, 1  ;;  %vm803_vm3 = vcmp.lt.s32.totalorder %v4436_v61, 7 }
  0xa6   : > { %v558_v4 = vld [vmem:[#allocation2 + $0x18] sm:$0xff]  ;;  %v559_v6 = vld [vmem:[#allocation2 + $0x8] sm:$0xff]  ;;  %v560_v8 = vmul.f32 %v556_v5, %v556_v5  ;;  %v561_v12 = vmul.f32 %v557_v9, %v557_v9  ;;  %3449 = vmatpush3.bf16.msra.mxu0 %v3662_v13  ;;  %v3674_v52 = vld [vmem:[%s4397_s12 + $0x10] sm:$0xff]   ;;  %v733_v10 = vand.u32 15, %v719_v2 }
  0xa7   : > { %v562_v7 = vmul.f32 %v558_v4, %v558_v4  ;;  %v563_v11 = vmul.f32 %v559_v6, %v559_v6  ;;  %3450 = vmatprep.subr.bf16.mxu0 %v3663_v14  ;;  %v3676_v54 = vld [vmem:[%s4397_s12] sm:$0xff]   ;;  %v3678_v56 = vld [vmem:[%s4403_s24 + $0x30] sm:$0xff]   ;;  %v3679_v57 = vld [vmem:[%s4403_s24 + $0x28] sm:$0xff]   ;;  %vm4443_vm0 = vcmp.eq.s32.totalorder %v726_v3, 0 }
  0xa8   : > { %564 = vadd.xlane.f32.xlu0 %v560_v8  ;;  %3469 = vmatpush3.bf16.msra.mxu1 %v3670_v48  ;;  %v3680_v58 = vld [vmem:[%s4403_s24 + $0x20] sm:$0xff]   ;;  %v3681_v59 = vld [vmem:[%s4403_s24 + $0x18] sm:$0xff]   ;;  %vm4460_vm5 = vcmp.eq.s32.totalorder %v733_v10, 15 }
  0xa9   : > { %568 = vadd.xlane.f32.xlu1 %v562_v7  ;;  %3470 = vmatprep.subr.bf16.mxu1 %v3671_v49  ;;  %v3225_v63 = vld [vmem:[%s4389_s19 + $0x1] ss:$0 sm:$0xff]  ;;  %v3237_v47 = vld [vmem:[%s4389_s19 + $0x5] ss:$0 sm:$0xff] }
  0xaa   : > { %3451 = vmatpush3.bf16.msra.mxu0 %v3663_v14  ;;  %v3235_v14 = vld [vmem:[%s4389_s19 + $0x3] ss:$0 sm:$0xff] }
  0xab   : > { %3452 = vmatprep.subr.bf16.mxu0 %v3664_v15 }
  0xac   : > { %566 = vadd.xlane.f32.xlu0 %v561_v12  ;;  %3471 = vmatpush3.bf16.msra.mxu1 %v3671_v49 }
  0xad   : > { %570 = vadd.xlane.f32.xlu1 %v563_v11  ;;  %3472 = vmatprep.subr.bf16.mxu1 %v3672_v50 }
  0xae   : > { %3453 = vmatpush3.bf16.msra.mxu0 %v3664_v15 }
  0xaf   : > { %3454 = vmatprep.subr.bf16.mxu0 %v3665_v16 }
  0xb0   : > { %3473 = vmatpush3.bf16.msra.mxu1 %v3672_v50 }
  0xb1   : > { %3474 = vmatprep.subr.bf16.mxu1 %v3673_v51 }
  0xb2   : > { %3455 = vmatpush3.bf16.msra.mxu0 %v3665_v16 }
  0xb3   : > { %3456 = vmatprep.subr.bf16.mxu0 %v3666_v17 }
  0xb4   : > { %3475 = vmatpush3.bf16.msra.mxu1 %v3673_v51 }
  0xb5   : > { %3476 = vmatprep.subr.bf16.mxu1 %v3674_v52 }
  0xb6   : > { %3457 = vmatpush3.bf16.msra.mxu0 %v3666_v17 }
  0xb7   : > { %3458 = vmatprep.subr.bf16.mxu0 %v3667_v18 }
  0xb8   : > { %3477 = vmatpush3.bf16.msra.mxu1 %v3674_v52 }
  0xb9   : > { %3478 = vmatprep.subr.bf16.mxu1 %v3675_v53 }
  0xba   : > { %3459 = vmatpush3.bf16.msra.mxu0 %v3667_v18 }
  0xbb   : > { %3460 = vmatprep.subr.bf16.mxu0 %v3668_v19 }
  0xbc   : > { %3479 = vmatpush3.bf16.msra.mxu1 %v3675_v53 }
  0xbd   : > { %3480 = vmatprep.subr.bf16.mxu1 %v3676_v54 }
  0xbe   : > { %3461 = vmatpush3.bf16.msra.mxu0 %v3668_v19 }
  0xbf   : > { %3486 = vmatprep.subr.bf16.mxu0 %v3677_v55 }
  0xc0   : > { %3481 = vmatpush3.bf16.msra.mxu1 %v3676_v54 }
 0x131   : > { %v565_v21 = vpop.xlane.xlu0 %564 }
 0x132   : > { %v569_v20 = vpop.xlane.xlu1 %568  ;;  %v572_v23 = vmul.f32 0.03125, %v565_v21  ;;  %v3234_v21 = vld [vmem:[%s4389_s19 + $0x2] ss:$0 sm:$0xff] }
 0x133   : > { %v574_v22 = vmul.f32 0.03125, %v569_v20 }
 0x134   : > { %v576_v25 = vadd.f32 1e-05, %v572_v23 }
 0x135   : > { %v578_v24 = vadd.f32 1e-05, %v574_v22  ;;  %v567_v27 = vpop.xlane.xlu0 %566 }
 0x136   : > { %v571_v26 = vpop.xlane.xlu1 %570  ;;  %v573_v29 = vmul.f32 0.03125, %v567_v27 }
 0x137   : > { %3685 = vrsqrt.f32 %v578_v24  ;;  %v575_v28 = vmul.f32 0.03125, %v571_v26  ;;  %v3236_v24 = vld [vmem:[%s4389_s19 + $0x4] ss:$0 sm:$0xff]  ;;  %v3683_v26 = vld [vmem:[%s4403_s24 + $0x8] sm:$0xff]  }
 0x138   : > { %3687 = vrsqrt.f32 %v576_v25  ;;  %v577_v31 = vadd.f32 1e-05, %v573_v29  ;;  %v3682_v25 = vld [vmem:[%s4403_s24 + $0x10] sm:$0xff]  }
 0x139   : > { %v579_v30 = vadd.f32 1e-05, %v575_v28 }
 0x13b   : > { %3689 = vrsqrt.f32 %v579_v30 }
 0x13c   : > { %3691 = vrsqrt.f32 %v577_v31 }
 0x144   : > { %v3686_v32 = vpop.eup %3685 }
 0x145   : > { %v3688_v33 = vpop.eup %3687  ;;  %v586_v34 = vmul.f32 %v3686_v32, %v558_v4 }
 0x146   : > { %v584_v36 = vmul.f32 %v3688_v33, %v556_v5 }
 0x147   : > { %v595_v41 = vmul.f32 %v3224_v37, %v586_v34 }
 0x148   : > { %v3690_v35 = vpop.eup %3689  ;;  %v593_v43 = vmul.f32 %v3224_v37, %v584_v36 }
 0x149   : > { %v3692_v38 = vpop.eup %3691  ;;  %v587_v39 = vmul.f32 %v3690_v35, %v559_v6  ;;  %v747_v6 = vand.u32 15, %v721_v62 }
 0x14a   : > { %v585_v40 = vmul.f32 %v3692_v38, %v557_v9  ;;  %v740_v9 = vand.u32 15, %v720_v1 }
 0x14b   : > { %v596_v42 = vmul.f32 %v3224_v37, %v587_v39  ;;  %vm4449_vm2 = vcmp.eq.s32.totalorder %v747_v6, 15 }
 0x14c   : > { %v594_v44 = vmul.f32 %v3224_v37, %v585_v40  ;;  %vm4456_vm4 = vcmp.eq.s32.totalorder %v740_v9, 0 }
 0x14d   : > { %v598_v45 = vpack.c.bf16 %v596_v42, %v595_v41 }
 0x14e   : > { %v597_v46 = vpack.c.bf16 %v594_v44, %v593_v43 }
 0x150   : > { %3462 = vmatprep.mubr.bf16.mxu0 %v597_v46 }
 0x151   : > { %3463 = vmatmul.mubr.bf16.vlgmr.msra.gmra.mxu0 %v598_v45 }
 0x152   : > { %3487 = vmatpush3.bf16.msra.mxu0 %v3677_v55 }
 0x153   : > { %3488 = vmatprep.subr.bf16.mxu0 %v3678_v56 }
 0x156   : > { %3489 = vmatpush3.bf16.msra.mxu0 %v3678_v56 }
 0x157   : > { %3490 = vmatprep.subr.bf16.mxu0 %v3679_v57 }
 0x15a   : > { %3491 = vmatpush3.bf16.msra.mxu0 %v3679_v57 }
 0x15b   : > { %3492 = vmatprep.subr.bf16.mxu0 %v3680_v58 }
 0x15e   : > { %3493 = vmatpush3.bf16.msra.mxu0 %v3680_v58 }
 0x15f   : > { %3494 = vmatprep.subr.bf16.mxu0 %v3681_v59 }
 0x162   : > { %3495 = vmatpush3.bf16.msra.mxu0 %v3681_v59 }
 0x163   : > { %3496 = vmatprep.subr.bf16.mxu0 %v3682_v25 }
 0x166   : > { %3497 = vmatpush3.bf16.msra.mxu0 %v3682_v25 }
 0x167   : > { %3498 = vmatprep.subr.bf16.mxu0 %v3683_v26 }
 0x16a   : > { %3499 = vmatpush3.bf16.msra.mxu0 %v3683_v26 }
 0x211   : > { %v3464_v0 = vpop.f32.mrf.mxu0 }
 0x212   : > { %v711_v4 = vadd.f32 %v3464_v0, %v3225_v63 }
 0x213   : > { %v702_v5 = vpop.f32.mrf.mxu0 }
 0x214   : > { %v703_v7 = vadd.f32 %v3225_v63, %v702_v5  ;;  %v776_v13 = vrot.slane %v711_v4, 7  ;;  %v801_v23 = vrot.slane %v711_v4, 1  ;;  %v836_v27 = vmul.f32 %v3235_v14, %v711_v4 }
 0x215   : > { %v3465_v8 = vpop.f32.mrf.mxu0 }
 0x216   : > { %v714_v11 = vadd.f32 %v3465_v8, %v3225_v63  ;;  %v774_v15 = vrot.slane %v703_v7, 7  ;;  %v799_v18 = vrot.slane %v703_v7, 1  ;;  %v834_v35 = vmul.f32 %v3235_v14, %v703_v7 }
 0x217   : > { %v705_v17 = vpop.f32.mrf.mxu0 }
 0x218   : > { %v777_v19 = vrot.slane %v714_v11, 7  ;;  %v802_v20 = vrot.slane %v714_v11, 1  ;;  %v706_v22 = vadd.f32 %v3225_v63, %v705_v17  ;;  %v837_v34 = vmul.f32 %v3235_v14, %v714_v11 }
 0x21a   : > { %v779_v28 = vsel %vm778_vm1, %v776_v13, %v777_v19  ;;  %v782_v29 = vsel %vm778_vm1, %v777_v19, %v774_v15  ;;  %v807_v30 = vsel %vm803_vm3, %v802_v20, %v799_v18  ;;  %v775_v37 = vrot.slane %v706_v22, 7 }
 0x21b   : > { %v791_v31 = vsel %vm4443_vm0, 0.0, %v782_v29  ;;  %v819_v32 = vsel %vm4449_vm2, 0.0, %v807_v30  ;;  %v828_v33 = vmul.f32 %v3234_v21, %v779_v28  ;;  %v800_v38 = vrot.slane %v706_v22, 1  ;;  %v3242_v28 = vld [vmem:[%s4389_s19 + $0x6] ss:$0 sm:$0xff] }
 0x21c   : > { %v850_v36 = vmul.f32 %v3236_v24, %v819_v32  ;;  %v804_v39 = vsel %vm803_vm3, %v801_v23, %v802_v20  ;;  %v835_v41 = vmul.f32 %v3235_v14, %v706_v22  ;;  %v825_v42 = vmul.f32 %v3234_v21, %v791_v31 }
 0x21d   : > { %v841_v40 = vadd.f32 %v837_v34, %v828_v33  ;;  %v780_v43 = vsel %vm778_vm1, %v775_v37, %v776_v13  ;;  %v781_v44 = vsel %vm778_vm1, %v774_v15, %v775_v37  ;;  %v805_v45 = vsel %vm803_vm3, %v800_v38, %v801_v23 }
 0x21e   : > { %v806_v46 = vsel %vm803_vm3, %v799_v18, %v800_v38  ;;  %v793_v49 = vsel %vm4456_vm4, 0.0, %v780_v43  ;;  %v826_v50 = vmul.f32 %v3234_v21, %v781_v44  ;;  %v817_v51 = vsel %vm4460_vm5, 0.0, %v805_v45 }
 0x21f   : > { %v854_v48 = vadd.f32 %v850_v36, %v841_v40  ;;  %v827_v52 = vmul.f32 %v3234_v21, %v793_v49  ;;  %v838_v53 = vadd.f32 %v834_v35, %v825_v42  ;;  %v847_v54 = vmul.f32 %v3236_v24, %v806_v46 }
 0x220   : > { %v848_v55 = vmul.f32 %v3236_v24, %v817_v51  ;;  %v839_v56 = vadd.f32 %v835_v41, %v826_v50  ;;  %v849_v58 = vmul.f32 %v3236_v24, %v804_v39  ;;  %v4506_v29 = vsub.s32 0, %v4436_v61 }
 0x221   : > { %v863_v57 = vadd.f32 %v3237_v47, %v854_v48  ;;  %v851_v59 = vadd.f32 %v847_v54, %v838_v53  ;;  %v840_v60 = vadd.f32 %v836_v27, %v827_v52  ;;  %v3684_v27 = vld [vmem:[%s4403_s24] sm:$0xff]   ;;  %v4509_v30 = vsub.s32 1, %v4436_v61 }
 0x222   : > { %v852_v62 = vadd.f32 %v848_v55, %v839_v56  ;;  %3500 = vmatprep.subr.bf16.mxu0 %v3684_v27  ;;  %v4514_v36 = vsub.s32 3, %v4436_v61  ;;  %v1718_v37 = vsub.s32 2, %v4436_v61  ;;  %v4520_v41 = vsub.s32 5, %v4436_v61 }
 0x223   : > { %v3241_v63 = vmul.f32 -1.442695, %v863_v57  ;;  %v860_v0 = vadd.f32 %v3237_v47, %v851_v59  ;;  %v853_v1 = vadd.f32 %v849_v58, %v840_v60  ;;  %3501 = vmatpush3.bf16.msra.mxu0 %v3684_v27  ;;  %v1734_v42 = vsub.s32 4, %v4436_v61 }
 0x224   : > { %v861_v2 = vadd.f32 %v3237_v47, %v852_v62  ;;  %v1758_v51 = vsub.s32 7, %v4436_v61  ;;  %v1750_v52 = vsub.s32 6, %v4436_v61 }
 0x225   : > { %3693 = vpow2.f32 %v3241_v63  ;;  %v3238_v3 = vmul.f32 -1.442695, %v860_v0  ;;  %v862_v4 = vadd.f32 %v3237_v47, %v853_v1 }
 0x226   : > { %v3239_v5 = vmul.f32 -1.442695, %v861_v2 }
 0x227   : > { %3695 = vpow2.f32 %v3238_v3  ;;  %v3240_v6 = vmul.f32 -1.442695, %v862_v4 }
 0x228   : > { %3697 = vpow2.f32 %v3239_v5 }
 0x229   : > { %3699 = vpow2.f32 %v3240_v6 }
 0x232   : > { %v3694_v7 = vpop.eup %3693 }
 0x233   : > { %v879_v8 = vadd.f32 1.0, %v3694_v7 }
 0x234   : > { %v3696_v9 = vpop.eup %3695 }
 0x235   : > { %v3698_v10 = vpop.eup %3697  ;;  %v876_v11 = vadd.f32 1.0, %v3696_v9  ;;  %3701 = vrcp.f32 %v879_v8 }
 0x236   : > { %v3700_v12 = vpop.eup %3699  ;;  %v877_v13 = vadd.f32 1.0, %v3698_v10 }
 0x237   : > { %3703 = vrcp.f32 %v876_v11  ;;  %v878_v14 = vadd.f32 1.0, %v3700_v12 }
 0x238   : > { %3705 = vrcp.f32 %v877_v13 }
 0x239   : > { %3707 = vrcp.f32 %v878_v14 }
 0x242   : > { %v3702_v15 = vpop.eup %3701 }
 0x243   : > { %v4495_v22 = vmul.f32 %v3702_v15, %v863_v57 }
 0x244   : > { %v3704_v16 = vpop.eup %3703 }
 0x245   : > { %v3706_v17 = vpop.eup %3705  ;;  %v4489_v18 = vmul.f32 %v3704_v16, %v860_v0  ;;  %v3251_v16 = vld [vmem:[%s4389_s19 + $0x7] ss:$0 sm:$0xff] }
 0x246   : > { %v3708_v19 = vpop.eup %3707  ;;  %v4491_v20 = vmul.f32 %v3706_v17, %v861_v2 }
 0x247   : > { %v4493_v21 = vmul.f32 %v3708_v19, %v862_v4 }
 0x248   : > { %v892_v23 = vpack.c.bf16 %v4491_v20, %v4489_v18 }
 0x249   : > { %v893_v24 = vpack.c.bf16 %v4495_v22, %v4493_v21 }
 0x24a   : > { %3482 = vmatprep.mubr.bf16.mxu1 %v892_v23 }
 0x24b   : > { %3483 = vmatmul.mubr.bf16.vlgmr.msra.gmra.mxu1 %v893_v24 }
 0x30b   : > { %v3484_v31 = vpop.f32.mrf.mxu1 }
 0x30c   : > { %v1006_v32 = vadd.f32 %v3484_v31, %v3242_v28 }
 0x30d   : > { %v997_v33 = vpop.f32.mrf.mxu1 }
 0x30e   : > { %v1839_v34 = vrot.slane %v1006_v32, %v4509_v30  ;;  %v1831_v35 = vrot.slane %v1006_v32, %v4506_v29  ;;  %v998_v43 = vadd.f32 %v3242_v28, %v997_v33  ;;  %v1855_v45 = vrot.slane %v1006_v32, %v4514_v36 }
 0x30f   : > { %v3485_v38 = vpop.f32.mrf.mxu1  ;;  %v1847_v46 = vrot.slane %v1006_v32, %v1718_v37  ;;  %v1871_v49 = vrot.slane %v1006_v32, %v4520_v41  ;;  %v1863_v50 = vrot.slane %v1006_v32, %v1734_v42  ;;  %v1887_v53 = vrot.slane %v1006_v32, %v1758_v51 }
 0x310   : > { %1842 = vbcast.lane.b32.xlu1 %v1839_v34, 264  ;;  %1834 = vbcast.lane.b32.xlu0 %v1831_v35, 264  ;;  %v4517_v39 = vadd.f32 %v3485_v38, %v3242_v28  ;;  %v1879_v54 = vrot.slane %v1006_v32, %v1750_v52  ;;  %v1711_v55 = vrot.slane %v998_v43, %v4509_v30 }
 0x311   : > { %v1000_v40 = vpop.f32.mrf.mxu1  ;;  %v1703_v56 = vrot.slane %v998_v43, %v4506_v29  ;;  %v1719_v57 = vrot.slane %v998_v43, %v1718_v37  ;;  %v1735_v58 = vrot.slane %v998_v43, %v1734_v42  ;;  %v1727_v59 = vrot.slane %v998_v43, %v4514_v36 }
 0x312   : > { %v4523_v44 = vadd.f32 %v3242_v28, %v1000_v40  ;;  %v1013_v48 = vpack.c.bf16 %v4517_v39, %v1006_v32  ;;  %v1751_v60 = vrot.slane %v998_v43, %v1750_v52  ;;  %v1743_v62 = vrot.slane %v998_v43, %v4520_v41 }
 0x313   : > { %v1895_v63 = vrot.slane %v4517_v39, %v4506_v29  ;;  %v1759_v0 = vrot.slane %v998_v43, %v1758_v51  ;;  %v1911_v1 = vrot.slane %v4517_v39, %v1718_v37  ;;  %v1903_v2 = vrot.slane %v4517_v39, %v4509_v30 }
 0x314   : > { %1858 = vbcast.lane.b32.xlu1 %v1855_v45, 264  ;;  %1850 = vbcast.lane.b32.xlu0 %v1847_v46, 264  ;;  %v1012_v47 = vpack.c.bf16 %v4523_v44, %v998_v43  ;;  %v1927_v3 = vrot.slane %v4517_v39, %v1734_v42  ;;  %v1919_v4 = vrot.slane %v4517_v39, %v4514_v36 }
 0x315   : > { %v1767_v5 = vrot.slane %v4523_v44, %v4506_v29  ;;  %v1935_v6 = vrot.slane %v4517_v39, %v4520_v41  ;;  %v1783_v7 = vrot.slane %v4523_v44, %v1718_v37  ;;  %v1775_v8 = vrot.slane %v4523_v44, %v4509_v30 }
 0x316   : > { %3502 = vmatprep.mubr.bf16.mxu0 %v1012_v47  ;;  %v1799_v9 = vrot.slane %v4523_v44, %v1734_v42  ;;  %v1791_v10 = vrot.slane %v4523_v44, %v4514_v36  ;;  %v1815_v11 = vrot.slane %v4523_v44, %v1750_v52  ;;  %v1807_v12 = vrot.slane %v4523_v44, %v4520_v41 }
 0x317   : > { %3503 = vmatmul.mubr.bf16.vlgmr.msra.gmra.mxu0 %v1013_v48  ;;  %v1943_v13 = vrot.slane %v4517_v39, %v1750_v52  ;;  %v1823_v14 = vrot.slane %v4523_v44, %v1758_v51  ;;  %v1951_v15 = vrot.slane %v4517_v39, %v1758_v51  ;;  %v1204_v44 = vld [vmem:[%s4405_s7] sm:$0xff] }
 0x318   : > { %1874 = vbcast.lane.b32.xlu1 %v1871_v49, 264  ;;  %1866 = vbcast.lane.b32.xlu0 %v1863_v50, 264  ;;  %v1205_v45 = vmul.f32 1.442695, %v1204_v44 }
 0x31c   : > { %1890 = vbcast.lane.b32.xlu1 %v1887_v53, 264  ;;  %1882 = vbcast.lane.b32.xlu0 %v1879_v54, 264 }
 0x320   : > { %1714 = vbcast.lane.b32.xlu1 %v1711_v55, 264  ;;  %1706 = vbcast.lane.b32.xlu0 %v1703_v56, 264 }
 0x324   : > { %1722 = vbcast.lane.b32.xlu1 %v1719_v57, 264  ;;  %1738 = vbcast.lane.b32.xlu0 %v1735_v58, 264  ;;  %v4136_v57 = vmov 1966171168  }
 0x325   : > { %v1218_v58 = vunpack.c.l.s4 %v4136_v57 }
 0x328   : > { %1730 = vbcast.lane.b32.xlu1 %v1727_v59, 264  ;;  %1754 = vbcast.lane.b32.xlu0 %v1751_v60, 264 }
 0x32c   : > { %1746 = vbcast.lane.b32.xlu1 %v1743_v62, 264  ;;  %1898 = vbcast.lane.b32.xlu0 %v1895_v63, 264 }
 0x330   : > { %1762 = vbcast.lane.b32.xlu1 %v1759_v0, 264  ;;  %1914 = vbcast.lane.b32.xlu0 %v1911_v1, 264  ;;  %v1219_v1 = vunpack.c.0.s8 %v1218_v58 }
 0x334   : > { %1906 = vbcast.lane.b32.xlu1 %v1903_v2, 264  ;;  %1930 = vbcast.lane.b32.xlu0 %v1927_v3, 264 }
 0x338   : > { %1922 = vbcast.lane.b32.xlu1 %v1919_v4, 264  ;;  %1770 = vbcast.lane.b32.xlu0 %v1767_v5, 264 }
 0x33c   : > { %1938 = vbcast.lane.b32.xlu1 %v1935_v6, 264  ;;  %1786 = vbcast.lane.b32.xlu0 %v1783_v7, 264 }
 0x340   : > { %1778 = vbcast.lane.b32.xlu1 %v1775_v8, 264  ;;  %1802 = vbcast.lane.b32.xlu0 %v1799_v9, 264  ;;  %v4593_v8 = vsub.s32 %v1219_v1, %v4436_v61 }
 0x344   : > { %1794 = vbcast.lane.b32.xlu1 %v1791_v10, 264  ;;  %1818 = vbcast.lane.b32.xlu0 %v1815_v11, 264 }
 0x348   : > { %1810 = vbcast.lane.b32.xlu1 %v1807_v12, 264  ;;  %1946 = vbcast.lane.b32.xlu0 %v1943_v13, 264 }
 0x34c   : > { %1826 = vbcast.lane.b32.xlu1 %v1823_v14, 264 }
 0x350   : > { %1954 = vbcast.lane.b32.xlu1 %v1951_v15, 264 }
 0x382   : > { %v4570_v35 = vpop.permute.xlu1 %1842  ;;  %v4577_v46 = vpop.permute.xlu0 %1834 }
 0x386   : > { %v4574_v42 = vpop.permute.xlu1 %1858  ;;  %v4581_v52 = vpop.permute.xlu0 %1850 }
 0x38a   : > { %v4579_v47 = vpop.permute.xlu1 %1874  ;;  %v4588_v62 = vpop.permute.xlu0 %1866 }
 0x38e   : > { %v4583_v53 = vpop.permute.xlu1 %1890  ;;  %v4595_v9 = vpop.permute.xlu0 %1882 }
 0x392   : > { %v4590_v63 = vpop.permute.xlu1 %1714 }
 0x396   : > { %v4597_v10 = vpop.permute.xlu1 %1722 }
 0x3d7   : > { %v3504_v17 = vpop.f32.mrf.mxu0 }
 0x3d8   : > { %v4560_v19 = vadd.f32 %v3504_v17, %v3251_v16 }
 0x3d9   : > { %v1117_v23 = vpop.f32.mrf.mxu0 }
 0x3da   : > { %v1146_v24 = vand.u32 2147483647, %v4560_v19  ;;  %v4563_v25 = vadd.f32 %v3251_v16, %v1117_v23  ;;  %v1134_v23 = vmax.f32 %v4560_v19, 0.0  ;;  %vm1138_vm6 = vcmp.ne.f32.partialorder %v4560_v19, %v4560_v19 }
 0x3db   : > { %v3505_v26 = vpop.f32.mrf.mxu0 }
 0x3dc   : > { %v1150_v27 = vsub.f32 0.0, %v1146_v24  ;;  %v1144_v28 = vand.u32 2147483647, %v4563_v25  ;;  %v4566_v30 = vadd.f32 %v3505_v26, %v3251_v16  ;;  %v1132_v26 = vmax.f32 %v4563_v25, 0.0 }
 0x3dd   : > { %v1120_v31 = vpop.f32.mrf.mxu0  ;;  %vm1136_vm8 = vcmp.ne.f32.partialorder %v4563_v25, %v4563_v25 }
 0x3de   : > { %v1156_v32 = vmul.f32 1.442695, %v1150_v27  ;;  %v1148_v33 = vsub.f32 0.0, %v1144_v28  ;;  %v4568_v34 = vadd.f32 %v3251_v16, %v1120_v31  ;;  %v1147_v36 = vand.u32 2147483647, %v4566_v30 }
 0x3df   : > { %vm1139_vm12 = vcmp.ne.f32.partialorder %v4566_v30, %v4566_v30 }
 0x3e0   : > { %3709 = vpow2.f32 %v1156_v32  ;;  %v1152_v37 = vmul.f32 1.442695, %v1148_v33  ;;  %v1151_v38 = vsub.f32 0.0, %v1147_v36  ;;  %v1145_v39 = vand.u32 2147483647, %v4568_v34 }
 0x3e1   : > { %vm1137_vm13 = vcmp.ne.f32.partialorder %v4568_v34, %v4568_v34 }
 0x3e2   : > { %3711 = vpow2.f32 %v1152_v37  ;;  %v1158_v40 = vmul.f32 1.442695, %v1151_v38  ;;  %v1149_v41 = vsub.f32 0.0, %v1145_v39  ;;  %v1135_v37 = vmax.f32 %v4566_v30, 0.0 }
 0x3e3   : > { %v1133_v39 = vmax.f32 %v4568_v34, 0.0 }
 0x3e4   : > { %3713 = vpow2.f32 %v1158_v40  ;;  %v1154_v43 = vmul.f32 1.442695, %v1149_v41  ;;  %v4614_v40 = vpop.permute.xlu0 %1706  ;;  %v4616_v41 = vpop.permute.xlu1 %1730 }
 0x3e6   : > { %3715 = vpow2.f32 %v1154_v43 }
 0x3e7   : > { %3717 = vpow2.f32 %v1205_v45 }
 0x3ed   : > { %v3710_v48 = vpop.eup %3709 }
 0x3ee   : > { %v1178_v49 = vadd.f32 1.0, %v3710_v48  ;;  %v1181_v60 = vmul.f32 -0.5, %v3710_v48  ;;  %v1184_v4 = vand.u32 2147483647, %v3710_v48 }
 0x3ef   : > { %v3712_v50 = vpop.eup %3711 }
 0x3f0   : > { %3719 = vlog2.f32 %v1178_v49  ;;  %v1160_v51 = vadd.f32 1.0, %v3712_v50  ;;  %v1163_v0 = vmul.f32 -0.5, %v3712_v50  ;;  %v1182_v2 = vadd.f32 1.0, %v1181_v60 }
 0x3f1   : > { %v3714_v54 = vpop.eup %3713  ;;  %v1166_v11 = vand.u32 2147483647, %v3712_v50  ;;  %vm1185_vm7 = vcmp.lt.f32.partialorder %v1184_v4, 0.0004427343 }
 0x3f2   : > { %3721 = vlog2.f32 %v1160_v51  ;;  %v1187_v55 = vadd.f32 1.0, %v3714_v54  ;;  %v1190_v5 = vmul.f32 -0.5, %v3714_v54  ;;  %v1164_v6 = vadd.f32 1.0, %v1163_v0 }
 0x3f3   : > { %v4585_v56 = vpop.eup %3715  ;;  %v1183_v14 = vmul.f32 %v3710_v48, %v1182_v2  ;;  %v1193_v16 = vand.u32 2147483647, %v3714_v54  ;;  %vm1167_vm9 = vcmp.lt.f32.partialorder %v1166_v11, 0.0004427343 }
 0x3f4   : > { %3723 = vlog2.f32 %v1187_v55  ;;  %v1169_v59 = vadd.f32 1.0, %v4585_v56  ;;  %v3718_v3 = vpop.eup %3717  ;;  %v1172_v12 = vmul.f32 -0.5, %v4585_v56  ;;  %v1191_v61 = vadd.f32 1.0, %v1190_v5 }
 0x3f5   : > { %v4600_v15 = vsub.f32 0.0, %v3718_v3  ;;  %v1165_v28 = vmul.f32 %v3712_v50, %v1164_v6  ;;  %vm4609_vm10 = vcmp.lt.f32.partialorder %v1193_v16, 0.0004427343  ;;  %v1175_v57 = vand.u32 2147483647, %v4585_v56 }
 0x3f6   : > { %3725 = vlog2.f32 %v1169_v59  ;;  %v1173_v32 = vadd.f32 1.0, %v1172_v12  ;;  %v4624_v48 = vmul.f32 %v3714_v54, %v1191_v61  ;;  %v4659_v12 = vpop.permute.xlu0 %1738 }
 0x3f7   : > { %vm4689_vm11 = vcmp.lt.f32.partialorder %v1175_v57, 0.0004427343 }
 0x3f8   : > { %v4642_v59 = vmul.f32 %v4585_v56, %v1173_v32 }
 0x3fd   : > { %v3720_v7 = vpop.eup %3719 }
 0x3fe   : > { %v1180_v13 = vmul.f32 0.6931472, %v3720_v7 }
 0x3ff   : > { %v3722_v17 = vpop.eup %3721 }
 0x400   : > { %v1186_v24 = vsel %vm1185_vm7, %v1183_v14, %v1180_v13  ;;  %v1162_v27 = vmul.f32 0.6931472, %v3722_v17  ;;  %v4661_v13 = vpop.permute.xlu1 %1746 }
 0x401   : > { %v1198_v31 = vadd.f32 %v1186_v24, %v1134_v23  ;;  %v3724_v33 = vpop.eup %3723 }
 0x402   : > { %v1168_v36 = vsel %vm1167_vm9, %v1165_v28, %v1162_v27  ;;  %v4622_v45 = vmul.f32 0.6931472, %v3724_v33 }
 0x403   : > { %v1202_v43 = vsel %vm1138_vm6, %v4560_v19, %v1198_v31  ;;  %v1196_v44 = vadd.f32 %v1168_v36, %v1132_v26  ;;  %v3726_v49 = vpop.eup %3725 }
 0x404   : > { %v1210_v50 = vmul.f32 %v1202_v43, %v4493_v21  ;;  %v1314_v51 = vcombine.high %v1202_v43, %v1202_v43  ;;  %v1321_v55 = vrot.slane %v1202_v43, %v4593_v8  ;;  %v1195_v19 = vsel %vm4609_vm10, %v4624_v48, %v4622_v45 }
 0x405   : > { %v4633_v58 = vsel %vm1136_vm8, %v4563_v25, %v1196_v44  ;;  %v4639_v54 = vmul.f32 0.6931472, %v3726_v49 }
 0x406   : > { %v1328_v60 = vrot.slane %v1314_v51, %v4593_v8  ;;  %v1329_v0 = vcombine.high %v1321_v55, %v1321_v55  ;;  %v1337_v1 = vrot.slane %v1321_v55, %v4593_v8  ;;  %v2058_v2 = vcombine.high %v1210_v50, %v1210_v50 }
 0x407   : > { %v2065_v3 = vrot.slane %v1210_v50, %v4593_v8  ;;  %v4649_v25 = vmul.f32 %v4633_v58, %v4489_v18  ;;  %v1216_v4 = vcombine.high %v4633_v58, %v4633_v58  ;;  %v4655_v5 = vrot.slane %v4633_v58, %v4593_v8 }
 0x408   : > { %v1330_v56 = vcombine.high %v1328_v60, %v1328_v60  ;;  %v1344_v6 = vrot.slane %v1328_v60, %v4593_v8  ;;  %v1351_v7 = vrot.slane %v1329_v0, %v4593_v8  ;;  %v1359_v11 = vcombine.high %v1337_v1, %v1337_v1 }
 0x409   : > { %v1479_v14 = vrot.slane %v1337_v1, %v4506_v29  ;;  %v2072_v16 = vrot.slane %v2058_v2, %v4593_v8  ;;  %v2073_v17 = vcombine.high %v2065_v3, %v2065_v3  ;;  %v2081_v23 = vrot.slane %v2065_v3, %v4593_v8 }
 0x40a   : > { %v1358_v61 = vrot.slane %v1330_v56, %v4593_v8  ;;  %v1360_v24 = vcombine.high %v1344_v6, %v1344_v6  ;;  %v1361_v26 = vcombine.high %v1351_v7, %v1351_v7  ;;  %v1483_v27 = vrot.slane %v1351_v7, %v4506_v29  ;;  %v4681_v56 = vpop.permute.xlu0 %1754 }
 0x40b   : > { %v1487_v28 = vrot.slane %v1359_v11, %v4506_v29  ;;  %v1495_v31 = vrot.slane %v1344_v6, %v4506_v29  ;;  %v1588_v32 = vmul.f32 %v1479_v14, %v4600_v15  ;;  %v2074_v33 = vcombine.high %v2072_v16, %v2072_v16  ;;  %v4683_v6 = vpop.permute.xlu1 %1762 }
 0x40c   : > { %v1362_v36 = vcombine.high %v1358_v61, %v1358_v61  ;;  %v1491_v43 = vrot.slane %v1361_v26, %v4506_v29  ;;  %v1499_v44 = vrot.slane %v1358_v61, %v4506_v29  ;;  %v1503_v49 = vrot.slane %v1360_v24, %v4506_v29 }
 0x40d   : > { %v1589_v50 = vmul.f32 %v1483_v27, %v4600_v15  ;;  %v1590_v51 = vmul.f32 %v1487_v28, %v4600_v15  ;;  %v1592_v55 = vmul.f32 %v1495_v31, %v4600_v15  ;;  %v1636_v60 = vmul.f32 1.442695, %v1588_v32 }
 0x40e   : > { %v1507_v0 = vrot.slane %v1362_v36, %v4506_v29  ;;  %v1591_v1 = vmul.f32 %v1491_v43, %v4600_v15  ;;  %v1593_v2 = vmul.f32 %v1499_v44, %v4600_v15  ;;  %v1594_v3 = vmul.f32 %v1503_v49, %v4600_v15  ;;  %v4697_v57 = vpop.permute.xlu0 %1898 }
 0x40f   : > { %3727 = vpow2.f32 %v1636_v60  ;;  %v1638_v7 = vmul.f32 1.442695, %v1589_v50  ;;  %v1640_v11 = vmul.f32 1.442695, %v1590_v51  ;;  %v1644_v14 = vmul.f32 1.442695, %v1592_v55  ;;  %v4699_v60 = vpop.permute.xlu1 %1906 }
 0x410   : > { %v1595_v61 = vmul.f32 %v1507_v0, %v4600_v15  ;;  %v1642_v24 = vmul.f32 1.442695, %v1591_v1  ;;  %v1646_v26 = vmul.f32 1.442695, %v1593_v2  ;;  %v1648_v27 = vmul.f32 1.442695, %v1594_v3 }
 0x411   : > { %3729 = vpow2.f32 %v1638_v7  ;;  %v2088_v28 = vrot.slane %v2072_v16, %v4593_v8  ;;  %v2095_v31 = vrot.slane %v2073_v17, %v4593_v8  ;;  %v2102_v32 = vrot.slane %v2074_v33, %v4593_v8 }
 0x412   : > { %3731 = vpow2.f32 %v1640_v11  ;;  %v1650_v43 = vmul.f32 1.442695, %v1595_v61  ;;  %v2103_v44 = vcombine.high %v2081_v23, %v2081_v23  ;;  %v2223_v49 = vrot.slane %v2081_v23, %v4506_v29 }
 0x413   : > { %3733 = vpow2.f32 %v1642_v24  ;;  %v2104_v50 = vcombine.high %v2088_v28, %v2088_v28  ;;  %v2105_v51 = vcombine.high %v2095_v31, %v2095_v31  ;;  %v2106_v55 = vcombine.high %v2102_v32, %v2102_v32 }
 0x414   : > { %3735 = vpow2.f32 %v1644_v14  ;;  %v2227_v16 = vrot.slane %v2095_v31, %v4506_v29  ;;  %v2231_v17 = vrot.slane %v2103_v44, %v4506_v29  ;;  %v2239_v33 = vrot.slane %v2088_v28, %v4506_v29 }
 0x415   : > { %3737 = vpow2.f32 %v1646_v26  ;;  %v2235_v0 = vrot.slane %v2105_v51, %v4506_v29  ;;  %v2243_v23 = vrot.slane %v2102_v32, %v4506_v29  ;;  %v2247_v1 = vrot.slane %v2104_v50, %v4506_v29 }
 0x416   : > { %3739 = vpow2.f32 %v1648_v27  ;;  %v2251_v2 = vrot.slane %v2106_v55, %v4506_v29  ;;  %v2332_v3 = vmul.f32 %v2223_v49, %v4577_v46  ;;  %v2333_v7 = vmul.f32 %v2227_v16, %v4570_v35 }
 0x417   : > { %3741 = vpow2.f32 %v1650_v43  ;;  %v2334_v11 = vmul.f32 %v2231_v17, %v4581_v52  ;;  %v2335_v14 = vmul.f32 %v2235_v0, %v4574_v42  ;;  %v2336_v61 = vmul.f32 %v2239_v33, %v4588_v62 }
 0x418   : > { %v2337_v24 = vmul.f32 %v2243_v23, %v4579_v47  ;;  %v2338_v26 = vmul.f32 %v2247_v1, %v4595_v9  ;;  %v2339_v28 = vmul.f32 %v2251_v2, %v4583_v53  ;;  %2364 = vst [vmem:[#allocation4 + $0x80] sm:$0xff] %v2332_v3  ;;  %2365 = vst [vmem:[#allocation4 + $0x88] sm:$0xff] %v2333_v7 }
 0x419   : > { %v1230_v35 = vrot.slane %v1216_v4, %v4593_v8  ;;  %2366 = vst [vmem:[#allocation4 + $0x90] sm:$0xff] %v2334_v11  ;;  %2367 = vst [vmem:[#allocation4 + $0x98] sm:$0xff] %v2335_v14  ;;  %v1231_v42 = vcombine.high %v4655_v5, %v4655_v5  ;;  %v1239_v46 = vrot.slane %v4655_v5, %v4593_v8  ;;  %v4743_v4 = vpop.permute.xlu1 %1922 }
 0x41a   : > { %2368 = vst [vmem:[#allocation4 + $0xa0] sm:$0xff] %v2336_v61  ;;  %v1960_v47 = vcombine.high %v4649_v25, %v4649_v25  ;;  %v4725_v52 = vrot.slane %v4649_v25, %v4593_v8  ;;  %2369 = vst [vmem:[#allocation4 + $0xa8] sm:$0xff] %v2337_v24  ;;  %v4735_v9 = vadd.f32 %v1195_v19, %v1135_v37  ;;  %v4741_v25 = vpop.permute.xlu0 %1914 }
 0x41b   : > { %2370 = vst [vmem:[#allocation4 + $0xb0] sm:$0xff] %v2338_v26  ;;  %2371 = vst [vmem:[#allocation4 + $0xb8] sm:$0xff] %v2339_v28  ;;  %v1232_v53 = vcombine.high %v1230_v35, %v1230_v35  ;;  %v1246_v62 = vrot.slane %v1230_v35, %v4593_v8  ;;  %v1177_v58 = vsel %vm4689_vm11, %v4642_v59, %v4639_v54 }
 0x41c   : > { %v1253_v5 = vrot.slane %v1231_v42, %v4593_v8  ;;  %v1261_v27 = vcombine.high %v1239_v46, %v1239_v46  ;;  %v1415_v31 = vrot.slane %v1239_v46, %v4506_v29  ;;  %v1974_v38 = vrot.slane %v1960_v47, %v4593_v8  ;;  %v3728_v32 = vpop.eup %3727 }
 0x41d   : > { %v1260_v37 = vrot.slane %v1232_v53, %v4593_v8  ;;  %v1262_v45 = vcombine.high %v1246_v62, %v1246_v62  ;;  %v1431_v48 = vrot.slane %v1246_v62, %v4506_v29  ;;  %v1975_v19 = vcombine.high %v4725_v52, %v4725_v52  ;;  %1684 = vst [vmem:[#allocation3 + $0x80] sm:$0xff] %v3728_v32  ;;  %v4766_v35 = vpop.permute.xlu1 %1938 }
 0x41e   : > { %v1263_v43 = vcombine.high %v1253_v5, %v1253_v5  ;;  %v1419_v44 = vrot.slane %v1253_v5, %v4506_v29  ;;  %v1423_v49 = vrot.slane %v1261_v27, %v4506_v29  ;;  %v1572_v50 = vmul.f32 %v1415_v31, %v4600_v15  ;;  %v3730_v51 = vpop.eup %3729  ;;  %v4764_v28 = vpop.permute.xlu0 %1930 }
 0x41f   : > { %v1264_v55 = vcombine.high %v1260_v37, %v1260_v37  ;;  %v1435_v16 = vrot.slane %v1260_v37, %v4506_v29  ;;  %v1439_v17 = vrot.slane %v1262_v45, %v4506_v29  ;;  %v1576_v33 = vmul.f32 %v1431_v48, %v4600_v15  ;;  %v3732_v0 = vpop.eup %3731  ;;  %1685 = vst [vmem:[#allocation3 + $0x88] sm:$0xff] %v3730_v51 }
 0x420   : > { %v1427_v23 = vrot.slane %v1263_v43, %v4506_v29  ;;  %v1573_v1 = vmul.f32 %v1419_v44, %v4600_v15  ;;  %v1574_v2 = vmul.f32 %v1423_v49, %v4600_v15  ;;  %v1604_v3 = vmul.f32 1.442695, %v1572_v50  ;;  %v3734_v7 = vpop.eup %3733  ;;  %1686 = vst [vmem:[#allocation3 + $0x90] sm:$0xff] %v3732_v0 }
 0x421   : > { %v1443_v11 = vrot.slane %v1264_v55, %v4506_v29  ;;  %v1577_v14 = vmul.f32 %v1435_v16, %v4600_v15  ;;  %v1578_v61 = vmul.f32 %v1439_v17, %v4600_v15  ;;  %v1612_v24 = vmul.f32 1.442695, %v1576_v33  ;;  %v3736_v26 = vpop.eup %3735  ;;  %1687 = vst [vmem:[#allocation3 + $0x98] sm:$0xff] %v3734_v7  ;;  %v4781_v0 = vpop.permute.xlu1 %1778 }
 0x422   : > { %v1575_v42 = vmul.f32 %v1427_v23, %v4600_v15  ;;  %3743 = vpow2.f32 %v1604_v3  ;;  %v1606_v46 = vmul.f32 1.442695, %v1573_v1  ;;  %v1608_v47 = vmul.f32 1.442695, %v1574_v2  ;;  %v3738_v53 = vpop.eup %3737  ;;  %1688 = vst [vmem:[#allocation3 + $0xa0] sm:$0xff] %v3736_v26  ;;  %v4779_v33 = vpop.permute.xlu0 %1770 }
 0x423   : > { %v1579_v62 = vmul.f32 %v1443_v11, %v4600_v15  ;;  %3745 = vpow2.f32 %v1612_v24  ;;  %v1614_v5 = vmul.f32 1.442695, %v1577_v14  ;;  %v1616_v27 = vmul.f32 1.442695, %v1578_v61  ;;  %v3740_v31 = vpop.eup %3739  ;;  %1689 = vst [vmem:[#allocation3 + $0xa8] sm:$0xff] %v3738_v53 }
 0x424   : > { %3747 = vpow2.f32 %v1606_v46  ;;  %v1610_v32 = vmul.f32 1.442695, %v1575_v42  ;;  %v1976_v37 = vcombine.high %v1974_v38, %v1974_v38  ;;  %v1983_v45 = vrot.slane %v4725_v52, %v4593_v8  ;;  %v3742_v48 = vpop.eup %3741  ;;  %1690 = vst [vmem:[#allocation3 + $0xb0] sm:$0xff] %v3740_v31 }
 0x425   : > { %3749 = vpow2.f32 %v1608_v47  ;;  %v1618_v43 = vmul.f32 1.442695, %v1579_v62  ;;  %v1990_v44 = vrot.slane %v1974_v38, %v4593_v8  ;;  %v1997_v49 = vrot.slane %v1975_v19, %v4593_v8  ;;  %1691 = vst [vmem:[#allocation3 + $0xb8] sm:$0xff] %v3742_v48 }
 0x426   : > { %3751 = vpow2.f32 %v1610_v32  ;;  %v2004_v50 = vrot.slane %v1976_v37, %v4593_v8  ;;  %v2005_v51 = vcombine.high %v1983_v45, %v1983_v45  ;;  %v2159_v55 = vrot.slane %v1983_v45, %v4506_v29 }
 0x427   : > { %3753 = vpow2.f32 %v1614_v5  ;;  %v2006_v16 = vcombine.high %v1990_v44, %v1990_v44  ;;  %v2007_v17 = vcombine.high %v1997_v49, %v1997_v49  ;;  %v2163_v52 = vrot.slane %v1997_v49, %v4506_v29 }
 0x428   : > { %3755 = vpow2.f32 %v1616_v27  ;;  %v2008_v38 = vcombine.high %v2004_v50, %v2004_v50  ;;  %v2167_v19 = vrot.slane %v2005_v51, %v4506_v29  ;;  %v2175_v23 = vrot.slane %v1990_v44, %v4506_v29 }
 0x429   : > { %3757 = vpow2.f32 %v1618_v43  ;;  %v2171_v1 = vrot.slane %v2007_v17, %v4506_v29  ;;  %v2179_v2 = vrot.slane %v2004_v50, %v4506_v29  ;;  %v2183_v3 = vrot.slane %v2006_v16, %v4506_v29 }
 0x42a   : > { %v2187_v7 = vrot.slane %v2008_v38, %v4506_v29  ;;  %v2316_v11 = vmul.f32 %v2159_v55, %v4614_v40  ;;  %v2317_v14 = vmul.f32 %v2163_v52, %v4590_v63  ;;  %v2318_v61 = vmul.f32 %v2167_v19, %v4597_v10 }
 0x42b   : > { %v2319_v24 = vmul.f32 %v2171_v1, %v4616_v41  ;;  %v2320_v26 = vmul.f32 %v2175_v23, %v4659_v12  ;;  %v2321_v42 = vmul.f32 %v2179_v2, %v4661_v13  ;;  %v2322_v46 = vmul.f32 %v2183_v3, %v4681_v56  ;;  %v4815_v13 = vpop.permute.xlu1 %1794 }
 0x42c   : > { %v2323_v47 = vmul.f32 %v2187_v7, %v4683_v6  ;;  %2348 = vst [vmem:[#allocation4] sm:$0xff] %v2316_v11  ;;  %2349 = vst [vmem:[#allocation4 + $0x8] sm:$0xff] %v2317_v14  ;;  %v1203_v63 = vsel %vm1139_vm12, %v4566_v30, %v4735_v9  ;;  %v1197_v10 = vadd.f32 %v1177_v58, %v1133_v39  ;;  %v4813_v30 = vpop.permute.xlu0 %1786 }
 0x42d   : > { %2350 = vst [vmem:[#allocation4 + $0x10] sm:$0xff] %v2318_v61  ;;  %2351 = vst [vmem:[#allocation4 + $0x18] sm:$0xff] %v2319_v24  ;;  %v1211_v40 = vmul.f32 %v1203_v63, %v4495_v22  ;;  %v1363_v41 = vcombine.high %v1203_v63, %v1203_v63  ;;  %v1370_v12 = vrot.slane %v1203_v63, %v4593_v8 }
 0x42e   : > { %2352 = vst [vmem:[#allocation4 + $0x20] sm:$0xff] %v2320_v26  ;;  %2353 = vst [vmem:[#allocation4 + $0x28] sm:$0xff] %v2321_v42  ;;  %v4818_v54 = vsel %vm1137_vm13, %v4568_v34, %v1197_v10 }
 0x42f   : > { %2354 = vst [vmem:[#allocation4 + $0x30] sm:$0xff] %v2322_v46  ;;  %2355 = vst [vmem:[#allocation4 + $0x38] sm:$0xff] %v2323_v47  ;;  %v3744_v39 = vpop.eup %3743  ;;  %v1377_v59 = vrot.slane %v1363_v41, %v4593_v8  ;;  %v1378_v56 = vcombine.high %v1370_v12, %v1370_v12  ;;  %v1386_v6 = vrot.slane %v1370_v12, %v4593_v8  ;;  %v4844_v19 = vpop.permute.xlu1 %1810 }
 0x430   : > { %v2107_v36 = vcombine.high %v1211_v40, %v1211_v40  ;;  %v3746_v9 = vpop.eup %3745  ;;  %1668 = vst [vmem:[#allocation3] sm:$0xff] %v3744_v39  ;;  %v2114_v58 = vrot.slane %v1211_v40, %v4593_v8  ;;  %v4825_v53 = vmul.f32 %v4818_v54, %v4491_v20  ;;  %v1265_v62 = vcombine.high %v4818_v54, %v4818_v54  ;;  %v4842_v38 = vpop.permute.xlu0 %1802 }
 0x431   : > { %v4831_v34 = vrot.slane %v4818_v54, %v4593_v8  ;;  %v3748_v5 = vpop.eup %3747  ;;  %1672 = vst [vmem:[#allocation3 + $0x20] sm:$0xff] %v3746_v9  ;;  %v1379_v27 = vcombine.high %v1377_v59, %v1377_v59  ;;  %v1393_v31 = vrot.slane %v1377_v59, %v4593_v8  ;;  %v1400_v32 = vrot.slane %v1378_v56, %v4593_v8 }
 0x432   : > { %v1408_v37 = vcombine.high %v1386_v6, %v1386_v6  ;;  %v3750_v45 = vpop.eup %3749  ;;  %1669 = vst [vmem:[#allocation3 + $0x8] sm:$0xff] %v3748_v5  ;;  %v1511_v48 = vrot.slane %v1386_v6, %v4506_v29  ;;  %v2121_v43 = vrot.slane %v2107_v36, %v4593_v8  ;;  %v2122_v44 = vcombine.high %v2114_v58, %v2114_v58 }
 0x433   : > { %v4838_v49 = vrot.slane %v2114_v58, %v4593_v8  ;;  %v3752_v50 = vpop.eup %3751  ;;  %1670 = vst [vmem:[#allocation3 + $0x10] sm:$0xff] %v3750_v45  ;;  %v1407_v51 = vrot.slane %v1379_v27, %v4593_v8  ;;  %v1409_v55 = vcombine.high %v1393_v31, %v1393_v31  ;;  %v1410_v16 = vcombine.high %v1400_v32, %v1400_v32  ;;  %v4862_v27 = vpop.permute.xlu1 %1826 }
 0x434   : > { %v1515_v17 = vrot.slane %v1400_v32, %v4506_v29  ;;  %v3754_v52 = vpop.eup %3753  ;;  %1671 = vst [vmem:[#allocation3 + $0x18] sm:$0xff] %v3752_v50  ;;  %v1519_v23 = vrot.slane %v1408_v37, %v4506_v29  ;;  %v1527_v1 = vrot.slane %v1393_v31, %v4506_v29  ;;  %v1596_v2 = vmul.f32 %v1511_v48, %v4600_v15  ;;  %v4860_v5 = vpop.permute.xlu0 %1818 }
 0x435   : > { %v2123_v3 = vcombine.high %v2121_v43, %v2121_v43  ;;  %v3756_v7 = vpop.eup %3755  ;;  %1673 = vst [vmem:[#allocation3 + $0x28] sm:$0xff] %v3754_v52  ;;  %v1411_v11 = vcombine.high %v1407_v51, %v1407_v51  ;;  %v1523_v14 = vrot.slane %v1410_v16, %v4506_v29  ;;  %v1531_v61 = vrot.slane %v1407_v51, %v4506_v29 }
 0x436   : > { %v1535_v24 = vrot.slane %v1409_v55, %v4506_v29  ;;  %v3758_v26 = vpop.eup %3757  ;;  %1674 = vst [vmem:[#allocation3 + $0x30] sm:$0xff] %v3756_v7  ;;  %v1597_v42 = vmul.f32 %v1515_v17, %v4600_v15  ;;  %v1598_v46 = vmul.f32 %v1519_v23, %v4600_v15  ;;  %v1600_v47 = vmul.f32 %v1527_v1, %v4600_v15 }
 0x437   : > { %v1652_v63 = vmul.f32 1.442695, %v1596_v2  ;;  %1675 = vst [vmem:[#allocation3 + $0x38] sm:$0xff] %v3758_v26  ;;  %v1539_v10 = vrot.slane %v1411_v11, %v4506_v29  ;;  %v1599_v40 = vmul.f32 %v1523_v14, %v4600_v15  ;;  %v1601_v41 = vmul.f32 %v1531_v61, %v4600_v15  ;;  %v1955_v11 = vpop.permute.xlu1 %1954 }
 0x438   : > { %v1602_v12 = vmul.f32 %v1535_v24, %v4600_v15  ;;  %v1654_v39 = vmul.f32 1.442695, %v1597_v42  ;;  %v1656_v59 = vmul.f32 1.442695, %v1598_v46  ;;  %v1660_v56 = vmul.f32 1.442695, %v1600_v47  ;;  %v1947_v7 = vpop.permute.xlu0 %1946 }
 0x439   : > { %3759 = vpow2.f32 %v1652_v63  ;;  %v1603_v6 = vmul.f32 %v1539_v10, %v4600_v15  ;;  %v1658_v36 = vmul.f32 1.442695, %v1599_v40  ;;  %v1662_v9 = vmul.f32 1.442695, %v1601_v41 }
 0x43a   : > { %v1664_v58 = vmul.f32 1.442695, %v1602_v12  ;;  %3761 = vpow2.f32 %v1654_v39  ;;  %v2137_v31 = vrot.slane %v2121_v43, %v4593_v8  ;;  %v2144_v32 = vrot.slane %v2122_v44, %v4593_v8 }
 0x43b   : > { %v2151_v37 = vrot.slane %v2123_v3, %v4593_v8  ;;  %3763 = vpow2.f32 %v1656_v59  ;;  %v1666_v45 = vmul.f32 1.442695, %v1603_v6  ;;  %v2152_v48 = vcombine.high %v4838_v49, %v4838_v49 }
 0x43c   : > { %v2255_v50 = vrot.slane %v4838_v49, %v4506_v29  ;;  %3765 = vpow2.f32 %v1658_v36  ;;  %v2153_v51 = vcombine.high %v2137_v31, %v2137_v31  ;;  %v2154_v55 = vcombine.high %v2144_v32, %v2144_v32 }
 0x43d   : > { %v2155_v16 = vcombine.high %v2151_v37, %v2151_v37  ;;  %3767 = vpow2.f32 %v1660_v56  ;;  %v2259_v17 = vrot.slane %v2144_v32, %v4506_v29  ;;  %v2263_v43 = vrot.slane %v2152_v48, %v4506_v29 }
 0x43e   : > { %v2271_v44 = vrot.slane %v2137_v31, %v4506_v29  ;;  %3769 = vpow2.f32 %v1662_v9  ;;  %v2267_v52 = vrot.slane %v2154_v55, %v4506_v29  ;;  %v2275_v23 = vrot.slane %v2151_v37, %v4506_v29 }
 0x43f   : > { %v2279_v1 = vrot.slane %v2153_v51, %v4506_v29  ;;  %3771 = vpow2.f32 %v1664_v58  ;;  %v2283_v49 = vrot.slane %v2155_v16, %v4506_v29  ;;  %v2340_v2 = vmul.f32 %v2255_v50, %v4697_v57 }
 0x440   : > { %v2341_v3 = vmul.f32 %v2259_v17, %v4699_v60  ;;  %3773 = vpow2.f32 %v1666_v45  ;;  %v2342_v14 = vmul.f32 %v2263_v43, %v4741_v25  ;;  %v2343_v61 = vmul.f32 %v2267_v52, %v4743_v4 }
 0x441   : > { %v2344_v24 = vmul.f32 %v2271_v44, %v4764_v28  ;;  %v2345_v26 = vmul.f32 %v2275_v23, %v4766_v35  ;;  %v2346_v42 = vmul.f32 %v2279_v1, %v1947_v7  ;;  %v2347_v46 = vmul.f32 %v2283_v49, %v1955_v11  ;;  %2372 = vst [vmem:[#allocation4 + $0xc0] sm:$0xff] %v2340_v2 }
 0x442   : > { %2373 = vst [vmem:[#allocation4 + $0xc8] sm:$0xff] %v2341_v3  ;;  %v1279_v57 = vrot.slane %v1265_v62, %v4593_v8  ;;  %2374 = vst [vmem:[#allocation4 + $0xd0] sm:$0xff] %v2342_v14  ;;  %v1280_v60 = vcombine.high %v4831_v34, %v4831_v34  ;;  %v1288_v25 = vrot.slane %v4831_v34, %v4593_v8 }
 0x443   : > { %2375 = vst [vmem:[#allocation4 + $0xd8] sm:$0xff] %v2343_v61  ;;  %2376 = vst [vmem:[#allocation4 + $0xe0] sm:$0xff] %v2344_v24  ;;  %v2009_v4 = vcombine.high %v4825_v53, %v4825_v53  ;;  %v2016_v28 = vrot.slane %v4825_v53, %v4593_v8 }
 0x444   : > { %2377 = vst [vmem:[#allocation4 + $0xe8] sm:$0xff] %v2345_v26  ;;  %2378 = vst [vmem:[#allocation4 + $0xf0] sm:$0xff] %v2346_v42  ;;  %v1281_v35 = vcombine.high %v1279_v57, %v1279_v57  ;;  %v1295_v54 = vrot.slane %v1279_v57, %v4593_v8  ;;  %v1302_v62 = vrot.slane %v1280_v60, %v4593_v8 }
 0x445   : > { %2379 = vst [vmem:[#allocation4 + $0xf8] sm:$0xff] %v2347_v46  ;;  %v1310_v47 = vcombine.high %v1288_v25, %v1288_v25  ;;  %v1447_v63 = vrot.slane %v1288_v25, %v4506_v29  ;;  %v2023_v10 = vrot.slane %v2009_v4, %v4593_v8  ;;  %v2024_v53 = vcombine.high %v2016_v28, %v2016_v28 }
 0x446   : > { %v3760_v34 = vpop.eup %3759  ;;  %v1309_v40 = vrot.slane %v1281_v35, %v4593_v8  ;;  %v1311_v41 = vcombine.high %v1295_v54, %v1295_v54  ;;  %v1463_v12 = vrot.slane %v1295_v54, %v4506_v29  ;;  %v1312_v39 = vcombine.high %v1302_v62, %v1302_v62 }
 0x447   : > { %1692 = vst [vmem:[#allocation3 + $0xc0] sm:$0xff] %v3760_v34  ;;  %v1451_v59 = vrot.slane %v1302_v62, %v4506_v29  ;;  %v1455_v56 = vrot.slane %v1310_v47, %v4506_v29  ;;  %v1580_v6 = vmul.f32 %v1447_v63, %v4600_v15  ;;  %v3762_v36 = vpop.eup %3761  ;;  %v2025_v24 = vcombine.high %v2023_v10, %v2023_v10 }
 0x448   : > { %v1313_v9 = vcombine.high %v1309_v40, %v1309_v40  ;;  %v1467_v58 = vrot.slane %v1309_v40, %v4506_v29  ;;  %v1471_v31 = vrot.slane %v1311_v41, %v4506_v29  ;;  %v1584_v32 = vmul.f32 %v1463_v12, %v4600_v15  ;;  %v3764_v37 = vpop.eup %3763  ;;  %1693 = vst [vmem:[#allocation3 + $0xc8] sm:$0xff] %v3762_v36 }
 0x449   : > { %v1459_v45 = vrot.slane %v1312_v39, %v4506_v29  ;;  %v1581_v48 = vmul.f32 %v1451_v59, %v4600_v15  ;;  %v1582_v50 = vmul.f32 %v1455_v56, %v4600_v15  ;;  %v1620_v51 = vmul.f32 1.442695, %v1580_v6  ;;  %v3766_v55 = vpop.eup %3765  ;;  %1694 = vst [vmem:[#allocation3 + $0xd0] sm:$0xff] %v3764_v37 }
 0x44a   : > { %v1475_v16 = vrot.slane %v1313_v9, %v4506_v29  ;;  %v1585_v17 = vmul.f32 %v1467_v58, %v4600_v15  ;;  %v1586_v43 = vmul.f32 %v1471_v31, %v4600_v15  ;;  %v1628_v44 = vmul.f32 1.442695, %v1584_v32  ;;  %v3768_v52 = vpop.eup %3767  ;;  %1695 = vst [vmem:[#allocation3 + $0xd8] sm:$0xff] %v3766_v55 }
 0x44b   : > { %v1583_v23 = vmul.f32 %v1459_v45, %v4600_v15  ;;  %3775 = vpow2.f32 %v1620_v51  ;;  %v1622_v1 = vmul.f32 1.442695, %v1581_v48  ;;  %v1624_v49 = vmul.f32 1.442695, %v1582_v50  ;;  %v3770_v2 = vpop.eup %3769  ;;  %1696 = vst [vmem:[#allocation3 + $0xe0] sm:$0xff] %v3768_v52 }
 0x44c   : > { %v1587_v3 = vmul.f32 %v1475_v16, %v4600_v15  ;;  %3777 = vpow2.f32 %v1628_v44  ;;  %v1630_v7 = vmul.f32 1.442695, %v1585_v17  ;;  %v1632_v11 = vmul.f32 1.442695, %v1586_v43  ;;  %v3772_v14 = vpop.eup %3771  ;;  %1697 = vst [vmem:[#allocation3 + $0xe8] sm:$0xff] %v3770_v2 }
 0x44d   : > { %3779 = vpow2.f32 %v1622_v1  ;;  %v1626_v61 = vmul.f32 1.442695, %v1583_v23  ;;  %v2032_v26 = vrot.slane %v2016_v28, %v4593_v8  ;;  %v3774_v42 = vpop.eup %3773  ;;  %1698 = vst [vmem:[#allocation3 + $0xf0] sm:$0xff] %v3772_v14  ;;  %v2039_v57 = vrot.slane %v2023_v10, %v4593_v8 }
 0x44e   : > { %3781 = vpow2.f32 %v1624_v49  ;;  %v1634_v46 = vmul.f32 1.442695, %v1587_v3  ;;  %v2046_v60 = vrot.slane %v2024_v53, %v4593_v8  ;;  %1699 = vst [vmem:[#allocation3 + $0xf8] sm:$0xff] %v3774_v42  ;;  %v2053_v15 = vrot.slane %v2025_v24, %v4593_v8 }
 0x44f   : > { %3783 = vpow2.f32 %v1626_v61  ;;  %v2054_v25 = vcombine.high %v2032_v26, %v2032_v26  ;;  %v2191_v4 = vrot.slane %v2032_v26, %v4506_v29  ;;  %v2055_v35 = vcombine.high %v2039_v57, %v2039_v57 }
 0x450   : > { %3785 = vpow2.f32 %v1630_v7  ;;  %v2056_v54 = vcombine.high %v2046_v60, %v2046_v60  ;;  %v2195_v28 = vrot.slane %v2046_v60, %v4506_v29  ;;  %v2057_v62 = vcombine.high %v2053_v15, %v2053_v15 }
 0x451   : > { %3787 = vpow2.f32 %v1632_v11  ;;  %v2199_v47 = vrot.slane %v2054_v25, %v4506_v29  ;;  %v2207_v63 = vrot.slane %v2039_v57, %v4506_v29  ;;  %v2211_v34 = vrot.slane %v2053_v15, %v4506_v29 }
 0x452   : > { %3789 = vpow2.f32 %v1634_v46  ;;  %v2203_v10 = vrot.slane %v2056_v54, %v4506_v29  ;;  %v2215_v8 = vrot.slane %v2055_v35, %v4506_v29  ;;  %v2219_v40 = vrot.slane %v2057_v62, %v4506_v29 }
 0x453   : > { %v2324_v41 = vmul.f32 %v2191_v4, %v4779_v33  ;;  %v2325_v12 = vmul.f32 %v2195_v28, %v4781_v0  ;;  %v2326_v53 = vmul.f32 %v2199_v47, %v4813_v30  ;;  %v2328_v59 = vmul.f32 %v2207_v63, %v4842_v38 }
 0x454   : > { %v2327_v39 = vmul.f32 %v2203_v10, %v4815_v13  ;;  %v2329_v56 = vmul.f32 %v2211_v34, %v4844_v19  ;;  %v2330_v6 = vmul.f32 %v2215_v8, %v4860_v5  ;;  %v2331_v36 = vmul.f32 %v2219_v40, %v4862_v27 }
 0x455   : > { %2356 = vst [vmem:[#allocation4 + $0x40] sm:$0xff] %v2324_v41  ;;  %2357 = vst [vmem:[#allocation4 + $0x48] sm:$0xff] %v2325_v12  ;;  %v4936_v27 = vmov 0.0  }
 0x456   : > { %2358 = vst [vmem:[#allocation4 + $0x50] sm:$0xff] %v2326_v53  ;;  %2359 = vst [vmem:[#allocation4 + $0x58] sm:$0xff] %v2327_v39 }
 0x457   : > { %2360 = vst [vmem:[#allocation4 + $0x60] sm:$0xff] %v2328_v59  ;;  %2361 = vst [vmem:[#allocation4 + $0x68] sm:$0xff] %v2329_v56 }
 0x458   : > { %2362 = vst [vmem:[#allocation4 + $0x70] sm:$0xff] %v2330_v6  ;;  %2363 = vst [vmem:[#allocation4 + $0x78] sm:$0xff] %v2331_v36  ;;  %v3776_v29 = vpop.eup %3775 }
 0x459   : > { %v3778_v33 = vpop.eup %3777  ;;  %1676 = vst [vmem:[#allocation3 + $0x40] sm:$0xff] %v3776_v29 }
 0x45a   : > { %v3780_v0 = vpop.eup %3779  ;;  %1680 = vst [vmem:[#allocation3 + $0x60] sm:$0xff] %v3778_v33 }
 0x45b   : > { %v3782_v30 = vpop.eup %3781  ;;  %1677 = vst [vmem:[#allocation3 + $0x48] sm:$0xff] %v3780_v0 }
 0x45c   : > { %v3784_v13 = vpop.eup %3783  ;;  %1678 = vst [vmem:[#allocation3 + $0x50] sm:$0xff] %v3782_v30 }
 0x45d   : > { %v3786_v38 = vpop.eup %3785  ;;  %1679 = vst [vmem:[#allocation3 + $0x58] sm:$0xff] %v3784_v13 }
 0x45e   : > { %v3788_v19 = vpop.eup %3787  ;;  %1681 = vst [vmem:[#allocation3 + $0x68] sm:$0xff] %v3786_v38 }
 0x45f   : > { %v3790_v5 = vpop.eup %3789  ;;  %1682 = vst [vmem:[#allocation3 + $0x70] sm:$0xff] %v3788_v19 }
 0x460   : > { %1683 = vst [vmem:[#allocation3 + $0x78] sm:$0xff] %v3790_v5 }
 0x461 LB: >> { %s3375_s18 = sshll.u32 %s4115_s17, 6  ;;  %vm2499_vm14 = vcmask 1040384   ;;  %vm2501_vm15 = vcmask 1041408   ;;  %vm2503_vm0 = vcmask 1042432   ;;  %vm2505_vm1 = vcmask 1043456   ;;  %s3260_s6 = sshll.u32 %s4115_s17, 3  ;;  %s4115_s17 = sphi %s4938_s17, %s2385_s17   ;;  %v4111_v27 = vphi %v4936_v27, %v5119_v27  }
 0x462   : >> { %s4945_s20 = scalar_lea.vmem [#allocation3], %s3375_s18  ;;  %s4948_s27 = scalar_lea.vmem [#allocation4], %s3375_s18  ;;  %vm2507_vm2 = vcmask 1044480   ;;  %vm2509_vm3 = vcmask 1045504   ;;  %vm2511_vm4 = vcmask 1046528  }
 0x463   : >> { %v2393_v58 = vld [vmem:[%s4948_s27] sm:$0xff]  ;;  %v3267_v45 = vld [vmem:[%s4948_s27 + $0x8] sm:$0xff]  ;;  %v3273_v17 = vld [vmem:[%s4948_s27 + $0x10] sm:$0xff]  ;;  %s2513_s13 = scalar_lea.vmem [#allocation5], %s3260_s6  ;;  %s2385_s17 = sadd.s32 1, %s4115_s17  }
 0x464   : >> { %v3279_v2 = vld [vmem:[%s4948_s27 + $0x18] sm:$0xff]  ;;  %v3285_v46 = vld [vmem:[%s4948_s27 + $0x20] sm:$0xff]  ;;  %v3291_v47 = vld [vmem:[%s4948_s27 + $0x28] sm:$0xff]  ;;  %p2382_p7 = scmp.ge.s32.totalorder %s2385_s17, 2  }
 0x465   : >> { %v3297_v56 = vld [vmem:[%s4948_s27 + $0x30] sm:$0xff]  ;;  %s4980_s26 = smov (%p2382_p7), 0  }
 0x467   : >> { %v2390_v9 = vld [vmem:[%s4945_s20] sm:$0xff]  ;;  %v3264_v32 = vld [vmem:[%s4945_s20 + $0x8] sm:$0xff]  ;;  %v3270_v51 = vld [vmem:[%s4945_s20 + $0x10] sm:$0xff] }
 0x468   : >> { %v2391_v31 = vmul.f32 %v4111_v27, %v2390_v9  ;;  %v3276_v23 = vld [vmem:[%s4945_s20 + $0x18] sm:$0xff]  ;;  %v3282_v61 = vld [vmem:[%s4945_s20 + $0x20] sm:$0xff]  ;;  %v3288_v4 = vld [vmem:[%s4945_s20 + $0x28] sm:$0xff] }
 0x469   : >> { %v3294_v41 = vld [vmem:[%s4945_s20 + $0x30] sm:$0xff]  ;;  %v3300_v30 = vld [vmem:[%s4945_s20 + $0x38] sm:$0xff] }
 0x46a   : >> { %v2394_v37 = vadd.f32 %v2393_v58, %v2391_v31  ;;  %v3303_v9 = vld [vmem:[%s4948_s27 + $0x38] sm:$0xff] }
 0x46c   : >> { %v2395_v48 = vrot.slane %v2394_v37, 4  ;;  %v2405_v50 = vmul.f32 %v3264_v32, %v2394_v37 }
 0x46e   : >> { %v2396_v55 = vadd.f32 %v2395_v48, %v2394_v37  ;;  %v2408_v16 = vadd.f32 %v3267_v45, %v2405_v50 }
 0x470   : >> { %v2409_v43 = vrot.slane %v2408_v16, 4  ;;  %v2419_v44 = vmul.f32 %v3270_v51, %v2408_v16  ;;  %v2397_v52 = vrot.slane %v2396_v55, 2 }
 0x472   : >> { %v2410_v1 = vadd.f32 %v2409_v43, %v2408_v16  ;;  %v2422_v49 = vadd.f32 %v3273_v17, %v2419_v44  ;;  %v2398_v14 = vadd.f32 %v2397_v52, %v2396_v55 }
 0x474   : >> { %v2411_v3 = vrot.slane %v2410_v1, 2  ;;  %v2423_v7 = vrot.slane %v2422_v49, 4  ;;  %v2433_v11 = vmul.f32 %v3276_v23, %v2422_v49  ;;  %v2399_v25 = vrot.slane %v2398_v14, 1 }
 0x476   : >> { %v2412_v24 = vadd.f32 %v2411_v3, %v2410_v1  ;;  %v2424_v26 = vadd.f32 %v2423_v7, %v2422_v49  ;;  %v2436_v42 = vadd.f32 %v3279_v2, %v2433_v11  ;;  %v2400_v8 = vadd.f32 %v2399_v25, %v2398_v14 }
 0x478   : >> { %v2425_v57 = vrot.slane %v2424_v26, 2  ;;  %v2437_v60 = vrot.slane %v2436_v42, 4  ;;  %v2447_v15 = vmul.f32 %v3282_v61, %v2436_v42  ;;  %v2413_v35 = vrot.slane %v2412_v24, 1 }
 0x47a   : >> { %v2426_v54 = vadd.f32 %v2425_v57, %v2424_v26  ;;  %v2438_v28 = vadd.f32 %v2437_v60, %v2436_v42  ;;  %v2450_v62 = vadd.f32 %v3285_v46, %v2447_v15  ;;  %v2414_v12 = vadd.f32 %v2413_v35, %v2412_v24 }
 0x47b   : > { %v4978_v46 = vmov (%p2382_p7), 0.0  }
 0x47c   : >> { %v2439_v63 = vrot.slane %v2438_v28, 2  ;;  %v2451_v10 = vrot.slane %v2450_v62, 4  ;;  %v2461_v34 = vmul.f32 %v3288_v4, %v2450_v62  ;;  %v2427_v40 = vrot.slane %v2426_v54, 1 }
 0x47d   : >> { %v2500_v5 = vsel %vm2499_vm14, %v2400_v8, %v2414_v12 }
 0x47e   : >> { %v2440_v53 = vadd.f32 %v2439_v63, %v2438_v28  ;;  %v2452_v39 = vadd.f32 %v2451_v10, %v2450_v62  ;;  %v2464_v59 = vadd.f32 %v3291_v47, %v2461_v34  ;;  %v2428_v0 = vadd.f32 %v2427_v40, %v2426_v54 }
 0x480   : >> { %v2441_v6 = vrot.slane %v2440_v53, 1  ;;  %v2453_v36 = vrot.slane %v2452_v39, 2  ;;  %v2465_v29 = vrot.slane %v2464_v59, 4  ;;  %v2475_v33 = vmul.f32 %v3294_v41, %v2464_v59 }
 0x481   : >> { %v2502_v45 = vsel %vm2501_vm15, %v2500_v5, %v2428_v0 }
 0x482   : >> { %v2454_v13 = vadd.f32 %v2453_v36, %v2452_v39  ;;  %v2466_v38 = vadd.f32 %v2465_v29, %v2464_v59  ;;  %v2478_v19 = vadd.f32 %v3297_v56, %v2475_v33  ;;  %v2442_v27 = vadd.f32 %v2441_v6, %v2440_v53 }
 0x484   : >> { %v2455_v58 = vrot.slane %v2454_v13, 1  ;;  %v2467_v31 = vrot.slane %v2466_v38, 2  ;;  %v2479_v32 = vrot.slane %v2478_v19, 4  ;;  %v2489_v37 = vmul.f32 %v3300_v30, %v2478_v19 }
 0x485   : >> { %v2504_v44 = vsel %vm2503_vm0, %v2502_v45, %v2442_v27 }
 0x486   : >> { %v2468_v48 = vadd.f32 %v2467_v31, %v2466_v38  ;;  %v2480_v50 = vadd.f32 %v2479_v32, %v2478_v19  ;;  %v2492_v51 = vadd.f32 %v3303_v9, %v2489_v37   ;;  %v2456_v55 = vadd.f32 %v2455_v58, %v2454_v13 }
 0x488   : >> { %v2469_v16 = vrot.slane %v2468_v48, 1  ;;  %v2481_v17 = vrot.slane %v2480_v50, 2  ;;  %v2493_v43 = vrot.slane %v2492_v51, 4  ;;  %v2506_v49 = vsel %vm2505_vm1, %v2504_v44, %v2456_v55 }
 0x489   : >> { %v5119_v27 = vmov %v2492_v51 }
 0x48a   : >> { %v2470_v52 = vadd.f32 %v2469_v16, %v2468_v48  ;;  %v2482_v23 = vadd.f32 %v2481_v17, %v2480_v50  ;;  %v2494_v1 = vadd.f32 %v2493_v43, %v2492_v51 }
 0x48c   : >> { %v2483_v2 = vrot.slane %v2482_v23, 1  ;;  %v2495_v3 = vrot.slane %v2494_v1, 2  ;;  %v2508_v14 = vsel %vm2507_vm2, %v2506_v49, %v2470_v52 }
 0x48e   : >> { %v2484_v7 = vadd.f32 %v2483_v2, %v2482_v23  ;;  %v2496_v11 = vadd.f32 %v2495_v3, %v2494_v1 }
 0x490   : >> { %v2497_v61 = vrot.slane %v2496_v11, 1  ;;  %v2510_v24 = vsel %vm2509_vm3, %v2508_v14, %v2484_v7 }
 0x491   : > { %2384 = sbr.rel (!%p2382_p7) target bundleno = 1121 (0x461), region = 212 }
 0x492   : >> { %v2498_v26 = vadd.f32 %v2497_v61, %v2496_v11 }
 0x494   : >> { %v2512_v42 = vsel %vm2511_vm4, %v2510_v24, %v2498_v26 }
 0x495   : >> { %2514 = vst [vmem:[%s2513_s13] sm:$0xff] %v2512_v42 }
 0x496 LB: >> { %s3390_s11 = sshll.u32 %s4123_s26, 6  ;;  %s3352_s21 = sshll.u32 %s4123_s26, 3  ;;  %s4123_s26 = sphi %s4980_s26, %s2520_s26   ;;  %v4119_v46 = vphi %v4978_v46, %v5120_v46  }
 0x497   : >> { %s4987_s25 = scalar_lea.vmem [#allocation3], %s3390_s11  ;;  %s4990_s14 = scalar_lea.vmem [#allocation4], %s3390_s11 }
 0x498   : >> { %v3306_v57 = vld [vmem:[%s4987_s25 + $0x80] sm:$0xff]  ;;  %v3312_v25 = vld [vmem:[%s4987_s25 + $0x88] sm:$0xff]  ;;  %v3318_v62 = vld [vmem:[%s4987_s25 + $0x90] sm:$0xff]  ;;  %s3091_s15 = scalar_lea.vmem [#allocation5], %s3352_s21  ;;  %s2520_s26 = sadd.s32 1, %s4123_s26  }
 0x499   : >> { %v3309_v60 = vld [vmem:[%s4990_s14 + $0x80] sm:$0xff]  ;;  %v2527_v15 = vmul.f32 %v4119_v46, %v3306_v57  ;;  %v3315_v35 = vld [vmem:[%s4990_s14 + $0x88] sm:$0xff]  ;;  %v3321_v10 = vld [vmem:[%s4990_s14 + $0x90] sm:$0xff]  ;;  %p2517_p4 = scmp.ge.s32.totalorder %s2520_s26, 2  }
 0x49a   : >> { %v3324_v41 = vld [vmem:[%s4987_s25 + $0x98] sm:$0xff]  ;;  %v3330_v29 = vld [vmem:[%s4987_s25 + $0xa0] sm:$0xff]  ;;  %v3336_v9 = vld [vmem:[%s4987_s25 + $0xa8] sm:$0xff]  ;;  %s5121_s22 = sld [smem:[#allocation25_spill]] (%p2517_p4) }
 0x49b   : >> { %v2530_v4 = vadd.f32 %v3309_v60, %v2527_v15  ;;  %v3327_v39 = vld [vmem:[%s4990_s14 + $0x98] sm:$0xff]  ;;  %v3333_v13 = vld [vmem:[%s4990_s14 + $0xa0] sm:$0xff]  ;;  %v3339_v45 = vld [vmem:[%s4990_s14 + $0xa8] sm:$0xff] }
 0x49c   : >> { %v3342_v17 = vld [vmem:[%s4987_s25 + $0xb0] sm:$0xff]  ;;  %v3348_v14 = vld [vmem:[%s4987_s25 + $0xb8] sm:$0xff] }
 0x49d   : >> { %v2531_v54 = vrot.slane %v2530_v4, 4  ;;  %v2541_v28 = vmul.f32 %v3312_v25, %v2530_v4  ;;  %v3345_v1 = vld [vmem:[%s4990_s14 + $0xb0] sm:$0xff]  ;;  %v3351_v57 = vld [vmem:[%s4990_s14 + $0xb8] sm:$0xff] }
 0x49f   : >> { %v2532_v47 = vadd.f32 %v2531_v54, %v2530_v4  ;;  %v2544_v63 = vadd.f32 %v3315_v35, %v2541_v28 }
 0x4a0   : > { %p3364_p9 = scmp.ne.s32.totalorder (%p2517_p4), %s5121_s22, 1 }
 0x4a1   : >> { %v2545_v34 = vrot.slane %v2544_v63, 4  ;;  %v2555_v8 = vmul.f32 %v3318_v62, %v2544_v63  ;;  %v2533_v40 = vrot.slane %v2532_v47, 2 }
 0x4a3   : >> { %v2546_v12 = vadd.f32 %v2545_v34, %v2544_v63  ;;  %v2558_v53 = vadd.f32 %v3321_v10, %v2555_v8  ;;  %v2534_v36 = vadd.f32 %v2533_v40, %v2532_v47 }
 0x4a5   : >> { %v2547_v59 = vrot.slane %v2546_v12, 2  ;;  %v2559_v56 = vrot.slane %v2558_v53, 4  ;;  %v2569_v6 = vmul.f32 %v3324_v41, %v2558_v53  ;;  %v2535_v27 = vrot.slane %v2534_v36, 1 }
 0x4a7   : >> { %v2548_v33 = vadd.f32 %v2547_v59, %v2546_v12  ;;  %v2560_v0 = vadd.f32 %v2559_v56, %v2558_v53  ;;  %v2572_v30 = vadd.f32 %v3327_v39, %v2569_v6  ;;  %v2536_v55 = vadd.f32 %v2535_v27, %v2534_v36 }
 0x4a9   : >> { %v2561_v38 = vrot.slane %v2560_v0, 2  ;;  %v2573_v19 = vrot.slane %v2572_v30, 4  ;;  %v2583_v5 = vmul.f32 %v3330_v29, %v2572_v30  ;;  %v2549_v58 = vrot.slane %v2548_v33, 1 }
 0x4ab   : >> { %v2562_v31 = vadd.f32 %v2561_v38, %v2560_v0  ;;  %v2574_v32 = vadd.f32 %v2573_v19, %v2572_v30  ;;  %v2586_v37 = vadd.f32 %v3333_v13, %v2583_v5  ;;  %v2550_v43 = vadd.f32 %v2549_v58, %v2548_v33  ;;  %v3791_v13 = vld [vmem:[%s4411_s30 + $0x38] sm:$0xff] (%p2517_p4)   ;;  %v3792_v38 = vld [vmem:[%s4411_s30 + $0x30] sm:$0xff] (%p2517_p4)   ;;  %v3793_v19 = vld [vmem:[%s4411_s30 + $0x28] sm:$0xff] (%p2517_p4)  }
 0x4ac   : > { %3506 = vmatprep.subr.bf16.mxu1 (%p2517_p4), %v3791_v13  ;;  %v3794_v5 = vld [vmem:[%s4411_s30 + $0x20] sm:$0xff] (%p2517_p4)   ;;  %v3354_v58 = vld [vmem:[%s4389_s19 + $0x8] ss:$0 sm:$0xff] (%p2517_p4) }
 0x4ad   : >> { %v2575_v48 = vrot.slane %v2574_v32, 2  ;;  %v2587_v50 = vrot.slane %v2586_v37, 4  ;;  %v2597_v51 = vmul.f32 %v3336_v9, %v2586_v37  ;;  %v2563_v16 = vrot.slane %v2562_v31, 1  ;;  %3507 = vmatpush3.bf16.msra.mxu1 (%p2517_p4), %v3791_v13 }
 0x4ae   : >> { %v2636_v42 = vsel %vm2499_vm14, %v2536_v55, %v2550_v43  ;;  %3508 = vmatprep.subr.bf16.mxu1 (%p2517_p4), %v3792_v38  ;;  %v3797_v55 = vld [vmem:[%s4411_s30 + $0x8] sm:$0xff] (%p2517_p4)   ;;  %v3798_v43 = vld [vmem:[%s4411_s30] sm:$0xff] (%p2517_p4)  }
 0x4af   : >> { %v2576_v44 = vadd.f32 %v2575_v48, %v2574_v32  ;;  %v2588_v52 = vadd.f32 %v2587_v50, %v2586_v37  ;;  %v2600_v23 = vadd.f32 %v3339_v45, %v2597_v51  ;;  %v2564_v11 = vadd.f32 %v2563_v16, %v2562_v31  ;;  %v3795_v48 = vld [vmem:[%s4411_s30 + $0x18] sm:$0xff] (%p2517_p4)   ;;  %v3796_v51 = vld [vmem:[%s4411_s30 + $0x10] sm:$0xff] (%p2517_p4)  }
 0x4b0   : > { %v2660_v31 = vmul.f32 (%p2517_p4), %v3354_v58, %v4489_v18  ;;  %v2661_v32 = vmul.f32 (%p2517_p4), %v3354_v58, %v4491_v20  ;;  %v2662_v16 = vmul.f32 (%p2517_p4), %v3354_v58, %v4493_v21  ;;  %v2663_v18 = vmul.f32 (%p2517_p4), %v3354_v58, %v4495_v22 }
 0x4b1   : >> { %v2577_v49 = vrot.slane %v2576_v44, 1  ;;  %v2589_v2 = vrot.slane %v2588_v52, 2  ;;  %v2601_v3 = vrot.slane %v2600_v23, 4  ;;  %v2611_v7 = vmul.f32 %v3342_v17, %v2600_v23  ;;  %3509 = vmatpush3.bf16.msra.mxu1 (%p2517_p4), %v3792_v38 }
 0x4b2   : >> { %v2638_v35 = vsel %vm2501_vm15, %v2636_v42, %v2564_v11  ;;  %3510 = vmatprep.subr.bf16.mxu1 (%p2517_p4), %v3793_v19 }
 0x4b3   : >> { %v2590_v61 = vadd.f32 %v2589_v2, %v2588_v52  ;;  %v2602_v24 = vadd.f32 %v2601_v3, %v2600_v23  ;;  %v2614_v26 = vadd.f32 %v3345_v1, %v2611_v7  ;;  %v2578_v46 = vadd.f32 %v2577_v49, %v2576_v44  ;;  %v3355_v1 = vld [vmem:[%s4389_s19 + $0x9] ss:$0 sm:$0xff] (%p2517_p4) }
 0x4b5   : >> { %v2591_v60 = vrot.slane %v2590_v61, 1  ;;  %v2603_v15 = vrot.slane %v2602_v24, 2  ;;  %v2615_v25 = vrot.slane %v2614_v26, 4  ;;  %v2625_v4 = vmul.f32 %v3348_v14, %v2614_v26  ;;  %3511 = vmatpush3.bf16.msra.mxu1 (%p2517_p4), %v3793_v19 }
 0x4b6   : >> { %v2640_v8 = vsel %vm2503_vm0, %v2638_v35, %v2578_v46  ;;  %3512 = vmatprep.subr.bf16.mxu1 (%p2517_p4), %v3794_v5 }
 0x4b7   : >> { %v2604_v54 = vadd.f32 %v2603_v15, %v2602_v24  ;;  %v2616_v28 = vadd.f32 %v2615_v25, %v2614_v26  ;;  %v2628_v62 = vadd.f32 %v3351_v57, %v2625_v4   ;;  %v2592_v47 = vadd.f32 %v2591_v60, %v2590_v61 }
 0x4b9   : >> { %v2605_v63 = vrot.slane %v2604_v54, 1  ;;  %v2617_v10 = vrot.slane %v2616_v28, 2  ;;  %v2629_v34 = vrot.slane %v2628_v62, 4  ;;  %v2642_v53 = vsel %vm2505_vm1, %v2640_v8, %v2592_v47  ;;  %3513 = vmatpush3.bf16.msra.mxu1 (%p2517_p4), %v3794_v5 }
 0x4ba   : >> { %v5120_v46 = vmov %v2628_v62  ;;  %3514 = vmatprep.subr.bf16.mxu1 (%p2517_p4), %v3795_v48 }
 0x4bb   : >> { %v2606_v40 = vadd.f32 %v2605_v63, %v2604_v54  ;;  %v2618_v41 = vadd.f32 %v2617_v10, %v2616_v28  ;;  %v2630_v12 = vadd.f32 %v2629_v34, %v2628_v62 }
 0x4bd   : >> { %v2619_v39 = vrot.slane %v2618_v41, 1  ;;  %v2631_v59 = vrot.slane %v2630_v12, 2  ;;  %v2644_v36 = vsel %vm2507_vm2, %v2642_v53, %v2606_v40  ;;  %3515 = vmatpush3.bf16.msra.mxu1 (%p2517_p4), %v3795_v48 }
 0x4be   : > { %3516 = vmatprep.subr.bf16.mxu1 (%p2517_p4), %v3796_v51 }
 0x4bf   : >> { %v2620_v56 = vadd.f32 %v2619_v39, %v2618_v41  ;;  %v2632_v6 = vadd.f32 %v2631_v59, %v2630_v12 }
 0x4c1   : >> { %v2633_v29 = vrot.slane %v2632_v6, 1  ;;  %v2646_v33 = vsel %vm2509_vm3, %v2644_v36, %v2620_v56  ;;  %3517 = vmatpush3.bf16.msra.mxu1 (%p2517_p4), %v3796_v51 }
 0x4c2   : > { %2519 = sbr.rel (!%p2517_p4) target bundleno = 1174 (0x496), region = 223  ;;  %3518 = vmatprep.subr.bf16.mxu1 (%p2517_p4), %v3797_v55 }
 0x4c3   : >> { %v2634_v0 = vadd.f32 %v2633_v29, %v2632_v6 }
 0x4c5   : >> { %v2648_v30 = vsel %vm2511_vm4, %v2646_v33, %v2634_v0  ;;  %3519 = vmatpush3.bf16.msra.mxu1 (%p2517_p4), %v3797_v55 }
 0x4c6   : >> { %3353 = vst [vmem:[%s3091_s15 + $0x10] sm:$0xff] %v2648_v30  ;;  %3520 = vmatprep.subr.bf16.mxu1 (%p2517_p4), %v3798_v43 }
 0x4c7   : > { %s5122_s12 = sld [smem:[#allocation30_spill]] (!%p3364_p9) }
 0x4c9   : > { %3521 = vmatpush3.bf16.msra.mxu1 %v3798_v43 }
 0x4cd   : > { %v2651_v27 = vld [vmem:[#allocation5] sm:$0xff]  ;;  %v2652_v9 = vld [vmem:[#allocation5 + $0x8] sm:$0xff]  ;;  %v2653_v20 = vld [vmem:[#allocation5 + $0x10] sm:$0xff] }
 0x4ce   : > { %v2664_v37 = vadd.f32 %v2660_v31, %v2651_v27  ;;  %v2665_v45 = vadd.f32 %v2661_v32, %v2652_v9  ;;  %v2654_v17 = vld [vmem:[#allocation5 + $0x18] sm:$0xff]  ;;  %v2666_v44 = vadd.f32 %v2662_v16, %v2653_v20 }
 0x4cf   : > { %v2667_v52 = vadd.f32 %v2663_v18, %v2654_v17 }
 0x4d0   : > { %v2668_v50 = vpack.c.bf16 %v2665_v45, %v2664_v37 }
 0x4d1   : > { %v2669_v23 = vpack.c.bf16 %v2667_v52, %v2666_v44 }
 0x4d2   : > { %3522 = vmatprep.mubr.bf16.mxu1 %v2668_v50 }
 0x4d3   : > { %3523 = vmatmul.mubr.bf16.vlgmr.msra.gmra.mxu1 %v2669_v23 }
 0x593   : > { %v3524_v49 = vpop.f32.mrf.mxu1 }
 0x594   : > { %v2782_v2 = vadd.f32 %v3524_v49, %v3355_v1 }
 0x595   : > { %v2773_v3 = vpop.f32.mrf.mxu1 }
 0x596   : > { %2790 = vst [vmem:[#allocation2 + $0x18] sm:$0xff] %v2782_v2  ;;  %v2774_v21 = vadd.f32 %v3355_v1, %v2773_v3 }
 0x597   : > { %v3525_v7 = vpop.f32.mrf.mxu1 }
 0x598   : > { %2788 = vst [vmem:[#allocation2 + $0x10] sm:$0xff] %v2774_v21  ;;  %v2785_v22 = vadd.f32 %v3525_v7, %v3355_v1  ;;  %2795 = sbr.rel (%p3364_p9) target bundleno = 1624 (0x658), region = 102 }
 0x599   : > { %v2776_v11 = vpop.f32.mrf.mxu1 }
 0x59a   : > { %2791 = vst [vmem:[#allocation2 + $0x8] sm:$0xff] %v2785_v22  ;;  %v2777_v14 = vadd.f32 %v3355_v1, %v2776_v11 }
 0x59c   : > { %2789 = vst [vmem:[#allocation2] sm:$0xff] %v2777_v14 }
 0x59d   : > { %v2798_v61 = vld [vmem:[#allocation2 + $0x18] sm:$0xff]  ;;  %v3365_v59 = vld [vmem:[%s5122_s12] ss:$0 sm:$0xff] }
 0x59e   : > { %v2802_v42 = vmul.f32 %v2798_v61, %v2798_v61 }
 0x59f   : > { %v2796_v24 = vld [vmem:[#allocation2 + $0x10] sm:$0xff] }
 0x5a0   : > { %v2800_v46 = vmul.f32 %v2796_v24, %v2796_v24  ;;  %2808 = vadd.xlane.f32.xlu1 %v2802_v42 }
 0x5a1   : > { %v2799_v26 = vld [vmem:[#allocation2 + $0x8] sm:$0xff] }
 0x5a2   : > { %2804 = vadd.xlane.f32.xlu0 %v2800_v46  ;;  %v2803_v60 = vmul.f32 %v2799_v26, %v2799_v26 }
 0x5a3   : > { %v2797_v57 = vld [vmem:[#allocation2] sm:$0xff] }
 0x5a4   : > { %v2801_v15 = vmul.f32 %v2797_v57, %v2797_v57  ;;  %2810 = vadd.xlane.f32.xlu1 %v2803_v60 }
 0x5a6   : > { %2806 = vadd.xlane.f32.xlu0 %v2801_v15 }
 0x629   : > { %v2809_v25 = vpop.xlane.xlu1 %2808 }
 0x62a   : > { %v2814_v35 = vmul.f32 0.03125, %v2809_v25 }
 0x62b   : > { %v2805_v4 = vpop.xlane.xlu0 %2804 }
 0x62c   : > { %v2812_v54 = vmul.f32 0.03125, %v2805_v4  ;;  %v2818_v28 = vadd.f32 1e-05, %v2814_v35 }
 0x62d   : > { %v2811_v47 = vpop.xlane.xlu1 %2810 }
 0x62e   : > { %v2816_v62 = vadd.f32 1e-05, %v2812_v54  ;;  %3799 = vrsqrt.f32 %v2818_v28  ;;  %v2815_v10 = vmul.f32 0.03125, %v2811_v47 }
 0x62f   : > { %v2807_v63 = vpop.xlane.xlu0 %2806 }
 0x630   : > { %v2813_v34 = vmul.f32 0.03125, %v2807_v63  ;;  %3801 = vrsqrt.f32 %v2816_v62  ;;  %v2819_v8 = vadd.f32 1e-05, %v2815_v10 }
 0x632   : > { %v2817_v40 = vadd.f32 1e-05, %v2813_v34  ;;  %3803 = vrsqrt.f32 %v2819_v8 }
 0x634   : > { %3805 = vrsqrt.f32 %v2817_v40 }
 0x63b   : > { %v3800_v41 = vpop.eup %3799 }
 0x63c   : > { %v2826_v53 = vmul.f32 %v3800_v41, %v2798_v61 }
 0x63d   : > { %v3802_v12 = vpop.eup %3801 }
 0x63e   : > { %v2824_v56 = vmul.f32 %v3802_v12, %v2796_v24  ;;  %v2837_v33 = vmul.f32 %v3365_v59, %v2826_v53 }
 0x63f   : > { %v3804_v39 = vpop.eup %3803 }
 0x640   : > { %v2827_v36 = vmul.f32 %v3804_v39, %v2799_v26  ;;  %v2835_v30 = vmul.f32 %v3365_v59, %v2824_v56 }
 0x641   : > { %v3806_v6 = vpop.eup %3805 }
 0x642   : > { %v2825_v29 = vmul.f32 %v3806_v6, %v2797_v57  ;;  %v2838_v0 = vmul.f32 %v3365_v59, %v2827_v36 }
 0x644   : > { %v2836_v13 = vmul.f32 %v3365_v59, %v2825_v29  ;;  %v2848_v38 = vadd.f32 %v2838_v0, %v2837_v33 }
 0x646   : > { %v2839_v19 = vadd.f32 %v2836_v13, %v2835_v30  ;;  %v2849_v5 = vrot.slane %v2848_v38, 4 }
 0x648   : > { %v2840_v27 = vrot.slane %v2839_v19, 4  ;;  %v2850_v9 = vadd.f32 %v2849_v5, %v2848_v38 }
 0x64a   : > { %v2841_v58 = vadd.f32 %v2840_v27, %v2839_v19  ;;  %v2851_v31 = vrot.slane %v2850_v9, 2 }
 0x64c   : > { %v2842_v32 = vrot.slane %v2841_v58, 2  ;;  %v2852_v37 = vadd.f32 %v2851_v31, %v2850_v9 }
 0x64e   : > { %v2843_v45 = vadd.f32 %v2842_v32, %v2841_v58  ;;  %v2853_v48 = vrot.slane %v2852_v37, 1 }
 0x650   : > { %v2844_v50 = vrot.slane %v2843_v45, 1  ;;  %v2854_v51 = vadd.f32 %v2853_v48, %v2852_v37 }
 0x652   : > { %v2845_v55 = vadd.f32 %v2844_v50, %v2843_v45  ;;  %v2855_v16 = vmul.f32 0.0625, %v2854_v51 }
 0x654   : > { %v2847_v18 = vmul.f32 0.0625, %v2845_v55 }
 0x656   : > { %v2857_v20 = vsel %vm2499_vm14, %v2847_v18, %v2855_v16 }
 0x657   : > { %2858 = vst [vmem:[#allocation18] sm:$0x3] %v2857_v20 }
 0x658 PF: > { %p3572_p10 = scmp.eq.s32.totalorder %s4297_s1, 1  ;;  %s4137_s23 = smov [#allocation18]  }
 0x659   : > { %s2868_s24 = sshll.u32 %s4137_s23, 4  ;;  %s2869_s24 = int_to_ptr.vmem [resolvable:$true] %s2868_s24 }
 0x65a   : > { %s4001_s8 = scalar_lea.vmem %s2869_s24, 32  ;;  %p4008_p8 = scmp.lt.s32.totalorder %s2869_s24, %s2869_s24 }
 0x65b   : > { %p4002_p3 = scmp.ne.s32.totalorder %s2869_s24, %s4001_s8  ;;  %p4009_p11 = scmp.lt.s32.totalorder %s4001_s8, %s4001_s8 }
 0x65d   : > { %p4003_p12 = pnand %p4002_p3, %p3572_p10  ;;  %p4010_p13 = por %p4009_p11, %p4008_p8 }
 0x65f   : > { %p4004_p5 = pneg %p4003_p12 }
 0x661   : > { %p4011_p0 = pnand %p4010_p13, %p4004_p5 }
 0x663   : > { %4014 = shalt.err (!%p4011_p0)
}
 0x664   : > { %s5123_s29 = sld [smem:[#allocation31_spill]] }
 0x66a   : > { %3543 = dma.vmem_to_hbm [thread:$0]  (%p3572_p10), %s2869_s24, 32, %s5123_s29, [#allocation8]  }
 0x66b   : > { %4082 = dma.done.wait (%p3572_p10), [#allocation8], 32  }
 0x66c   : > { %4084 = vsyncadd (%p3572_p10), [#allocation8], 4294967264 }
 0x66d PF: > { %s29_s10 = sadd.s32 1, %s4107_s10   ;;  %s5124_s17 = sld [smem:[#allocation24_spill]] }
 0x66e   : > { %p26_p2 = scmp.ge.s32.totalorder %s29_s10, 4   ;;  %s5125_s29 = sld [smem:[#allocation27_spill]] }
 0x66f   : > { %s5126_s18 = sld [smem:[#allocation26_spill]]  ;;  %s5127_s27 = smov %s4091_s28 }
 0x670   : > { %s5129_s30 = smov %s4103_s9 }
 0x671   :  { %28 = sbr.rel (!%p26_p2) target bundleno = 15 (0xf), region = 234 }
 0x673   : > { %s5128_s28 = smov %s5124_s17 }
 0x675   : > { %s5130_s9 = smov %s5126_s18 }
 0x676   :  { %2881 = vsyncpa [#allocation7], 1 }
 0x677   :  { %2883 = vsyncpa [#allocation7 + $0x1], 1 }
 0x678   :  { %2884 = vsyncpa [#allocation10], 1 }
 0x679   :  { %2886 = vsyncpa [#allocation10 + $0x1], 1 }
 0x67a   :  { %2887 = vsyncpa [#allocation13], 1 }
 0x67b   :  { %2889 = vsyncpa [#allocation13 + $0x1], 1 }
 0x67c   :  { %2890 = vsyncpa [#allocation16], 1 }
 0x67d   :  { %2892 = vsyncpa [#allocation16 + $0x1], 1 }
 0x67e   :  { %2893 = vsyncpa [#allocation8], 1 }
 0x67f   :  { %2895 = vsyncpa [#allocation8 + $0x1], 1 }

</bundles_post_ra>
